<compile_context>
chip_gen: v6e
topology: v6e:2x2x1
jax: 0.10.0
libtpu: 0.0.40
codegen_flags: <defaults>
</compile_context>

<pallas_src>
import functools
import math

import jax
import jax.numpy as jnp
from jax import lax
from jax.experimental import pallas as pl
from jax.experimental.pallas import tpu as pltpu

LN_EPS = 1e-5

VEC_ORDER = ["bq", "bk", "bv", "bo", "b1", "b2",
             "ln1_g", "ln1_b", "ln2_g", "ln2_b"]


# ----------------------------- kernel helpers -----------------------------

def _layernorm(x, gamma, beta):
    mu = jnp.mean(x, axis=-1, keepdims=True)
    var = jnp.mean((x - mu) ** 2, axis=-1, keepdims=True)
    return (x - mu) * lax.rsqrt(var + LN_EPS) * gamma + beta


def _unpack_vecs(vecs, D, F):
    """vecs: (10, max(D,F)) packed [bq,bk,bv,bo,b1,b2,ln1_g,ln1_b,ln2_g,ln2_b]."""
    return (vecs[0:1, :D], vecs[1:2, :D], vecs[2:3, :D], vecs[3:4, :D],
            vecs[4:5, :F], vecs[5:6, :D],
            vecs[6:7, :D], vecs[7:8, :D], vecs[8:9, :D], vecs[9:10, :D])


def _mha(q, k, v, *, Sq, Sk, D, H):
    """Head-batched multi-head attention.

    q: (Sq, D) bf16, k/v: (Sk, D) bf16  ->  (Sq, D) f32.
    No explicit transpose of K: contraction is on the last dim of both operands.
    """
    hd = D // H
    scale = 1.0 / math.sqrt(hd)
    qh = q.reshape(Sq, H, hd)
    kh = k.reshape(Sk, H, hd)
    vh = v.reshape(Sk, H, hd)
    s = jnp.einsum("qhd,khd->hqk", qh, kh,
                   preferred_element_type=jnp.float32) * scale      # (H, Sq, Sk)
    s = s - jnp.max(s, axis=-1, keepdims=True)
    e = jnp.exp(s)
    p = (e / jnp.sum(e, axis=-1, keepdims=True)).astype(jnp.bfloat16)  # exact softmax
    o = jnp.einsum("hqk,khd->qhd", p, vh,
                   preferred_element_type=jnp.float32)               # (Sq, H, hd)
    return o.reshape(Sq, D)


def _ffn_and_norms(x, attn, w1, w2, b1, b2, g1, be1, g2, be2):
    """Residual + LN1, ReLU FFN, residual + LN2 (all f32, bf16 MXU operands)."""
    x1 = _layernorm(x + attn, g1, be1)
    h1 = jnp.maximum(
        jnp.dot(x1.astype(jnp.bfloat16), w1, preferred_element_type=jnp.float32) + b1,
        0.0)
    ff = jnp.dot(h1.astype(jnp.bfloat16), w2, preferred_element_type=jnp.float32) + b2
    return _layernorm(x1 + ff, g2, be2)


def _self_layer(x, wqkv, wo, w1, w2, vecs, *, Sq, D, F, H):
    """Post-norm encoder layer with q = k = v = x.  x: (Sq, D) f32."""
    bq, bk, bv, bo, b1, b2, g1, be1, g2, be2 = _unpack_vecs(vecs, D, F)
    # TODO(synk): for D < 128 the lane slices below are relayouts; benchmark three
    # separate D-wide projections (or pad sections to 128 lanes) at small d_model.
    qkv = jnp.dot(x.astype(jnp.bfloat16), wqkv,
                  preferred_element_type=jnp.float32)                # (Sq, 3D)
    q = (qkv[:, :D] + bq).astype(jnp.bfloat16)
    k = (qkv[:, D:2 * D] + bk).astype(jnp.bfloat16)
    v = (qkv[:, 2 * D:] + bv).astype(jnp.bfloat16)
    attn = _mha(q, k, v, Sq=Sq, Sk=Sq, D=D, H=H)
    attn = jnp.dot(attn.astype(jnp.bfloat16), wo,
                   preferred_element_type=jnp.float32) + bo
    return _ffn_and_norms(x, attn, w1, w2, b1, b2, g1, be1, g2, be2)


def _cross_layer(x, kv_src, wq, wkv, wo, w1, w2, vecs, *, Sq, Sk, D, F, H):
    """Post-norm encoder layer with q = x, k = v = kv_src."""
    bq, bk, bv, bo, b1, b2, g1, be1, g2, be2 = _unpack_vecs(vecs, D, F)
    q = (jnp.dot(x.astype(jnp.bfloat16), wq,
                 preferred_element_type=jnp.float32) + bq).astype(jnp.bfloat16)
    kvp = jnp.dot(kv_src.astype(jnp.bfloat16), wkv,
                  preferred_element_type=jnp.float32)                # (Sk, 2D)
    k = (kvp[:, :D] + bk).astype(jnp.bfloat16)
    v = (kvp[:, D:] + bv).astype(jnp.bfloat16)
    attn = _mha(q, k, v, Sq=Sq, Sk=Sk, D=D, H=H)
    attn = jnp.dot(attn.astype(jnp.bfloat16), wo,
                   preferred_element_type=jnp.float32) + bo
    return _ffn_and_norms(x, attn, w1, w2, b1, b2, g1, be1, g2, be2)


# --------------------------------- kernel ---------------------------------

def refinement_kernel(vt_ref, cnn_ref,
                      wqkv1_ref, wo1_ref, w11_ref, w21_ref, vec1_ref,
                      wq2_ref, wkv2_ref, wo2_ref, w12_ref, w22_ref, vec2_ref,
                      out_ref, *, Sq, Sk, D, F, H):
    x = vt_ref[...].astype(jnp.float32)     # (Sq, D)  (batch dim squeezed by grid)
    c = cnn_ref[...].astype(jnp.float32)    # (Sk, D)

    y1 = _self_layer(x, wqkv1_ref[...], wo1_ref[...], w11_ref[...], w21_ref[...],
                     vec1_ref[...], Sq=Sq, D=D, F=F, H=H)
    y2 = _cross_layer(y1, c, wq2_ref[...], wkv2_ref[...], wo2_ref[...],
                      w12_ref[...], w22_ref[...], vec2_ref[...],
                      Sq=Sq, Sk=Sk, D=D, F=F, H=H)
    out_ref[...] = y2.astype(out_ref.dtype)


# ------------------------------ host wrapper ------------------------------

def _pack_vecs(p, D, F):
    L = max(D, F)

    def pad_row(v):  # (1, n) -> (1, L)
        return jnp.pad(v, ((0, 0), (0, L - v.shape[1])))

    return jnp.concatenate([pad_row(p[name]) for name in VEC_ORDER],
                           axis=0).astype(jnp.float32)               # (10, L)


def _pack_self(p):
    D = p["wq"].shape[0]
    F = p["w1"].shape[1]
    wqkv = jnp.concatenate([p["wq"], p["wk"], p["wv"]], axis=1).astype(jnp.bfloat16)
    return (wqkv, p["wo"].astype(jnp.bfloat16), p["w1"].astype(jnp.bfloat16),
            p["w2"].astype(jnp.bfloat16), _pack_vecs(p, D, F))


def _pack_cross(p):
    D = p["wq"].shape[0]
    F = p["w1"].shape[1]
    wkv = jnp.concatenate([p["wk"], p["wv"]], axis=1).astype(jnp.bfloat16)
    return (p["wq"].astype(jnp.bfloat16), wkv, p["wo"].astype(jnp.bfloat16),
            p["w1"].astype(jnp.bfloat16), p["w2"].astype(jnp.bfloat16),
            _pack_vecs(p, D, F))


def _vmem_budget_bytes(Sq, Sk, D, F, H):
    """Rough per-step VMEM footprint (resident weights + buffered tiles + temps)."""
    bf16, f32 = 2, 4
    L = max(D, F)
    weights = bf16 * (3 * D * D + D * D + 2 * D * F            # self layer
                      + D * D + 2 * D * D + D * D + 2 * D * F)  # cross layer
    vecs = f32 * 2 * 10 * L
    io = 2 * f32 * (Sq * D + Sk * D + Sq * D)                   # double-buffered tiles
    inter = f32 * (3 * Sq * D + 3 * Sk * D + 2 * H * Sq * max(Sq, Sk)
                   + Sq * F + 8 * Sq * D)
    budget = 4 * (weights + vecs + io + inter)                  # margin for (8,128) pad
    return int(min(max(budget, 8 << 20), 48 << 20))             # stay under v7x 64 MiB


def refinement_block(visual_tokens, cnn_output, self_params, cross_params, nhead):
    """visual_tokens: (B, Sq, D), cnn_output: (B, Sk, D) -> (B, Sq, D)."""
    B, Sq, D = visual_tokens.shape
    _, Sk, _ = cnn_output.shape
    F = self_params["w1"].shape[1]
    assert D % nhead == 0

    weights = _pack_self(self_params) + _pack_cross(cross_params)

    # Weights: full-array blocks with a constant index map -> DMA'd once, resident
    # in VMEM for all grid steps.  vt/cnn/out: one batch element per grid step.
    w_specs = [pl.BlockSpec(w.shape, lambda b: (0, 0)) for w in weights]

    kernel = functools.partial(refinement_kernel, Sq=Sq, Sk=Sk, D=D, F=F, H=nhead)

    out = pl.pallas_call(
        kernel,
        out_shape=jax.ShapeDtypeStruct((B, Sq, D), visual_tokens.dtype),
        grid=(B,),
        in_specs=[pl.BlockSpec((None, Sq, D), lambda b: (b, 0, 0)),
                  pl.BlockSpec((None, Sk, D), lambda b: (b, 0, 0))] + w_specs,
        out_specs=pl.BlockSpec((None, Sq, D), lambda b: (b, 0, 0)),
        compiler_params=pltpu.CompilerParams(
            dimension_semantics=("parallel",),
            vmem_limit_bytes=_vmem_budget_bytes(Sq, Sk, D, F, nhead)),
    )(visual_tokens, cnn_output, *weights)
    return out


# ------------------------- parameter init & reference -------------------------

def make_layer_params(key, d_model, dim_feedforward):
    D, F = d_model, dim_feedforward
    ks = jax.random.split(key, 10)
    r = lambda k, shape, s: jax.random.normal(k, shape, jnp.float32) * s
    return {
        "wq": r(ks[0], (D, D), 0.1), "wk": r(ks[1], (D, D), 0.1),
        "wv": r(ks[2], (D, D), 0.1),
        "bq": r(ks[3], (1, D), 0.02), "bk": r(ks[4], (1, D), 0.02),
        "bv": r(ks[5], (1, D), 0.02),
        "wo": r(ks[6], (D, D), 0.1), "bo": r(ks[7], (1, D), 0.02),
        "ln1_g": jnp.ones((1, D), jnp.float32),
        "ln1_b": jnp.zeros((1, D), jnp.float32),
        "w1": r(ks[8], (D, F), 0.1), "b1": jnp.zeros((1, F), jnp.float32),
        "w2": r(ks[9], (F, D), 0.1), "b2": jnp.zeros((1, D), jnp.float32),
        "ln2_g": jnp.ones((1, D), jnp.float32),
        "ln2_b": jnp.zeros((1, D), jnp.float32),
    }


def encoder_layer_ref(q, k, v, p, nhead):
    """Pure-JAX f32 reference (standard post-norm encoder layer, dropout = eval)."""
    B, Sq, D = q.shape
    head_dim = D // nhead
    scale = 1.0 / (head_dim ** 0.5)
    qp = jnp.einsum("bsd,de->bse", q, p["wq"]) + p["bq"]
    kp = jnp.einsum("bsd,de->bse", k, p["wk"]) + p["bk"]
    vp = jnp.einsum("bsd,de->bse", v, p["wv"]) + p["bv"]

    def split(x):
        return x.reshape(B, -1, nhead, head_dim).transpose(0, 2, 1, 3)

    qh, kh, vh = split(qp), split(kp), split(vp)
    s = jnp.einsum("bhqd,bhkd->bhqk", qh, kh) * scale
    w = jax.nn.softmax(s, axis=-1)
    a = jnp.einsum("bhqk,bhkd->bhqd", w, vh).transpose(0, 2, 1, 3).reshape(B, Sq, D)
    a = jnp.einsum("bsd,de->bse", a, p["wo"]) + p["bo"]
    x = q + a
    mu = x.mean(-1, keepdims=True); var = ((x - mu) ** 2).mean(-1, keepdims=True)
    x = (x - mu) * lax.rsqrt(var + LN_EPS) * p["ln1_g"] + p["ln1_b"]
    h1 = jax.nn.relu(jnp.einsum("bsd,df->bsf", x, p["w1"]) + p["b1"])
    ff = jnp.einsum("bsf,fd->bsd", h1, p["w2"]) + p["b2"]
    y = x + ff
    mu = y.mean(-1, keepdims=True); var = ((y - mu) ** 2).mean(-1, keepdims=True)
    return (y - mu) * lax.rsqrt(var + LN_EPS) * p["ln2_g"] + p["ln2_b"]


def refinement_block_ref(vt, cnn, self_p, cross_p, nhead):
    s = encoder_layer_ref(vt, vt, vt, self_p, nhead)
    return encoder_layer_ref(s, cnn, cnn, cross_p, nhead)


if __name__ == "__main__":
    d_model, nhead, dim_feedforward = 32, 4, 64
    B, num_tokens, cnn_seq = 2, 8, 16

    key = jax.random.PRNGKey(0)
    k_vt, k_cnn, k_p1, k_p2 = jax.random.split(key, 4)

    visual_tokens = jax.random.normal(k_vt, (B, num_tokens, d_model), jnp.float32)
    cnn_output = jax.random.normal(k_cnn, (B, cnn_seq, d_model), jnp.float32)

    self_params = make_layer_params(k_p1, d_model, dim_feedforward)
    cross_params = make_layer_params(k_p2, d_model, dim_feedforward)

    out = refinement_block(visual_tokens, cnn_output, self_params, cross_params, nhead)
    out = jax.block_until_ready(out)

    ref = refinement_block_ref(visual_tokens, cnn_output, self_params,
                               cross_params, nhead)
    assert out.shape == (B, num_tokens, d_model)
    # Tolerance (tightened vs. previous version): remaining error comes only from
    # bf16 MXU operands (f32 accumulation); LN/softmax math and the softmax
    # reciprocal are exact f32.
    assert jnp.allclose(out, ref, atol=3e-2, rtol=3e-2), "mismatch vs JAX reference"

    print("KERNEL_OK")
</pallas_src>

<mosaic_0001>
module attributes {stable_mosaic.version = 11 : i64} {
  func.func @refinement_kernel(%arg0: i32, %arg1: memref<1x8x32xf32, #tpu.memory_space<vmem>>, %arg2: memref<1x16x32xf32, #tpu.memory_space<vmem>>, %arg3: memref<32x96xbf16, #tpu.memory_space<vmem>>, %arg4: memref<32x32xbf16, #tpu.memory_space<vmem>>, %arg5: memref<32x64xbf16, #tpu.memory_space<vmem>>, %arg6: memref<64x32xbf16, #tpu.memory_space<vmem>>, %arg7: memref<10x64xf32, #tpu.memory_space<vmem>>, %arg8: memref<32x32xbf16, #tpu.memory_space<vmem>>, %arg9: memref<32x64xbf16, #tpu.memory_space<vmem>>, %arg10: memref<32x32xbf16, #tpu.memory_space<vmem>>, %arg11: memref<32x64xbf16, #tpu.memory_space<vmem>>, %arg12: memref<64x32xbf16, #tpu.memory_space<vmem>>, %arg13: memref<10x64xf32, #tpu.memory_space<vmem>>, %arg14: memref<1x8x32xf32, #tpu.memory_space<vmem>>) attributes {dimension_semantics = [#tpu.dimension_semantics<parallel>], iteration_bounds = array<i64: 2>, scalar_prefetch = 0 : i64, scratch_operands = 0 : i64, tpu.core_type = #tpu.core_type<tc>, window_params = [{transform_indices = @transform_0, window_bounds = array<i64: 1, 8, 32>}, {transform_indices = @transform_1, window_bounds = array<i64: 1, 16, 32>}, {pipeline_mode = #tpu.pipeline_mode<synchronous>, transform_indices = @transform_2, window_bounds = array<i64: 32, 96>}, {pipeline_mode = #tpu.pipeline_mode<synchronous>, transform_indices = @transform_3, window_bounds = array<i64: 32, 32>}, {pipeline_mode = #tpu.pipeline_mode<synchronous>, transform_indices = @transform_4, window_bounds = array<i64: 32, 64>}, {pipeline_mode = #tpu.pipeline_mode<synchronous>, transform_indices = @transform_5, window_bounds = array<i64: 64, 32>}, {pipeline_mode = #tpu.pipeline_mode<synchronous>, transform_indices = @transform_6, window_bounds = array<i64: 10, 64>}, {pipeline_mode = #tpu.pipeline_mode<synchronous>, transform_indices = @transform_7, window_bounds = array<i64: 32, 32>}, {pipeline_mode = #tpu.pipeline_mode<synchronous>, transform_indices = @transform_8, window_bounds = array<i64: 32, 64>}, {pipeline_mode = #tpu.pipeline_mode<synchronous>, transform_indices = @transform_9, window_bounds = array<i64: 32, 32>}, {pipeline_mode = #tpu.pipeline_mode<synchronous>, transform_indices = @transform_10, window_bounds = array<i64: 32, 64>}, {pipeline_mode = #tpu.pipeline_mode<synchronous>, transform_indices = @transform_11, window_bounds = array<i64: 64, 32>}, {pipeline_mode = #tpu.pipeline_mode<synchronous>, transform_indices = @transform_12, window_bounds = array<i64: 10, 64>}, {transform_indices = @transform_13, window_bounds = array<i64: 1, 8, 32>}]} {
    %c0 = arith.constant 0 : index
    %c0_0 = arith.constant 0 : index
    %c0_1 = arith.constant 0 : index
    %0 = vector.load %arg1[%c0, %c0_0, %c0_1] : memref<1x8x32xf32, #tpu.memory_space<vmem>>, vector<1x8x32xf32>
    %1 = vector.shape_cast %0 : vector<1x8x32xf32> to vector<8x32xf32>
    %c0_2 = arith.constant 0 : index
    %c0_3 = arith.constant 0 : index
    %c0_4 = arith.constant 0 : index
    %2 = vector.load %arg2[%c0_2, %c0_3, %c0_4] : memref<1x16x32xf32, #tpu.memory_space<vmem>>, vector<1x16x32xf32>
    %3 = vector.shape_cast %2 : vector<1x16x32xf32> to vector<16x32xf32>
    %c0_5 = arith.constant 0 : index
    %c0_6 = arith.constant 0 : index
    %4 = vector.load %arg3[%c0_5, %c0_6] : memref<32x96xbf16, #tpu.memory_space<vmem>>, vector<32x96xbf16>
    %c0_7 = arith.constant 0 : index
    %c0_8 = arith.constant 0 : index
    %5 = vector.load %arg4[%c0_7, %c0_8] : memref<32x32xbf16, #tpu.memory_space<vmem>>, vector<32x32xbf16>
    %c0_9 = arith.constant 0 : index
    %c0_10 = arith.constant 0 : index
    %6 = vector.load %arg5[%c0_9, %c0_10] : memref<32x64xbf16, #tpu.memory_space<vmem>>, vector<32x64xbf16>
    %c0_11 = arith.constant 0 : index
    %c0_12 = arith.constant 0 : index
    %7 = vector.load %arg6[%c0_11, %c0_12] : memref<64x32xbf16, #tpu.memory_space<vmem>>, vector<64x32xbf16>
    %c0_13 = arith.constant 0 : index
    %c0_14 = arith.constant 0 : index
    %8 = vector.load %arg7[%c0_13, %c0_14] : memref<10x64xf32, #tpu.memory_space<vmem>>, vector<10x64xf32>
    %9 = vector.extract_strided_slice %8 {offsets = [0, 0], sizes = [1, 32], strides = [1, 1]} : vector<10x64xf32> to vector<1x32xf32>
    %10 = vector.extract_strided_slice %8 {offsets = [1, 0], sizes = [1, 32], strides = [1, 1]} : vector<10x64xf32> to vector<1x32xf32>
    %11 = vector.extract_strided_slice %8 {offsets = [2, 0], sizes = [1, 32], strides = [1, 1]} : vector<10x64xf32> to vector<1x32xf32>
    %12 = vector.extract_strided_slice %8 {offsets = [3, 0], sizes = [1, 32], strides = [1, 1]} : vector<10x64xf32> to vector<1x32xf32>
    %13 = vector.extract_strided_slice %8 {offsets = [4, 0], sizes = [1, 64], strides = [1, 1]} : vector<10x64xf32> to vector<1x64xf32>
    %14 = vector.extract_strided_slice %8 {offsets = [5, 0], sizes = [1, 32], strides = [1, 1]} : vector<10x64xf32> to vector<1x32xf32>
    %15 = vector.extract_strided_slice %8 {offsets = [6, 0], sizes = [1, 32], strides = [1, 1]} : vector<10x64xf32> to vector<1x32xf32>
    %16 = vector.extract_strided_slice %8 {offsets = [7, 0], sizes = [1, 32], strides = [1, 1]} : vector<10x64xf32> to vector<1x32xf32>
    %17 = vector.extract_strided_slice %8 {offsets = [8, 0], sizes = [1, 32], strides = [1, 1]} : vector<10x64xf32> to vector<1x32xf32>
    %18 = vector.extract_strided_slice %8 {offsets = [9, 0], sizes = [1, 32], strides = [1, 1]} : vector<10x64xf32> to vector<1x32xf32>
    %19 = arith.truncf %1 : vector<8x32xf32> to vector<8x32xbf16>
    %cst = arith.constant dense<0.000000e+00> : vector<8x96xf32>
    %20 = tpu.matmul %19, %4, %cst {dimension_numbers = #tpu.dot_dimension_numbers<[1], [0], [0], [1], [0, 0, 1, 1], [], []>} : vector<8x32xbf16>, vector<32x96xbf16>, vector<8x96xf32> -> vector<8x96xf32>
    %21 = vector.extract_strided_slice %20 {offsets = [0, 0], sizes = [8, 32], strides = [1, 1]} : vector<8x96xf32> to vector<8x32xf32>
    %22 = vector.broadcast %9 : vector<1x32xf32> to vector<8x32xf32>
    %23 = arith.addf %21, %22 : vector<8x32xf32>
    %24 = arith.truncf %23 : vector<8x32xf32> to vector<8x32xbf16>
    %25 = vector.extract_strided_slice %20 {offsets = [0, 32], sizes = [8, 32], strides = [1, 1]} : vector<8x96xf32> to vector<8x32xf32>
    %26 = vector.broadcast %10 : vector<1x32xf32> to vector<8x32xf32>
    %27 = arith.addf %25, %26 : vector<8x32xf32>
    %28 = arith.truncf %27 : vector<8x32xf32> to vector<8x32xbf16>
    %29 = vector.extract_strided_slice %20 {offsets = [0, 64], sizes = [8, 32], strides = [1, 1]} : vector<8x96xf32> to vector<8x32xf32>
    %30 = vector.broadcast %11 : vector<1x32xf32> to vector<8x32xf32>
    %31 = arith.addf %29, %30 : vector<8x32xf32>
    %32 = arith.truncf %31 : vector<8x32xf32> to vector<8x32xbf16>
    %33 = vector.shape_cast %24 : vector<8x32xbf16> to vector<8x4x8xbf16>
    %34 = vector.shape_cast %28 : vector<8x32xbf16> to vector<8x4x8xbf16>
    %35 = vector.shape_cast %32 : vector<8x32xbf16> to vector<8x4x8xbf16>
    "tpu.trace_start"() <{level = 10 : i32, message = "qhd,khd->hqk"}> : () -> ()
    %cst_15 = arith.constant dense<0.000000e+00> : vector<4x8x8xf32>
    %36 = tpu.matmul %33, %34, %cst_15 {dimension_numbers = #tpu.dot_dimension_numbers<[2], [2], [0], [0], [0, 1, 0, 0, 1, 0], [1], [1]>} : vector<8x4x8xbf16>, vector<8x4x8xbf16>, vector<4x8x8xf32> -> vector<4x8x8xf32>
    "tpu.trace_stop"() : () -> ()
    %cst_16 = arith.constant 0.353553385 : f32
    %37 = vector.broadcast %cst_16 : f32 to vector<4x8x8xf32>
    %38 = arith.mulf %36, %37 : vector<4x8x8xf32>
    %cst_17 = arith.constant dense<0xFF800000> : vector<4x8xf32>
    %39 = vector.multi_reduction <maximumf>, %38, %cst_17 [2] : vector<4x8x8xf32> to vector<4x8xf32>
    %40 = vector.shape_cast %39 : vector<4x8xf32> to vector<4x8x1xf32>
    %41 = vector.broadcast %40 : vector<4x8x1xf32> to vector<4x8x8xf32>
    %42 = arith.subf %38, %41 : vector<4x8x8xf32>
    %43 = math.exp %42 : vector<4x8x8xf32>
    %cst_18 = arith.constant dense<0.000000e+00> : vector<4x8xf32>
    %44 = vector.multi_reduction <add>, %43, %cst_18 [2] : vector<4x8x8xf32> to vector<4x8xf32>
    %45 = vector.shape_cast %44 : vector<4x8xf32> to vector<4x8x1xf32>
    %46 = vector.broadcast %45 : vector<4x8x1xf32> to vector<4x8x8xf32>
    %47 = arith.divf %43, %46 : vector<4x8x8xf32>
    %48 = arith.truncf %47 : vector<4x8x8xf32> to vector<4x8x8xbf16>
    "tpu.trace_start"() <{level = 10 : i32, message = "hqk,khd->qhd"}> : () -> ()
    %cst_19 = arith.constant dense<0.000000e+00> : vector<4x8x8xf32>
    %49 = tpu.matmul %35, %48, %cst_19 {dimension_numbers = #tpu.dot_dimension_numbers<[0], [2], [2], [1], [0, 1, 0, 2, 1, 1], [1], [0]>} : vector<8x4x8xbf16>, vector<4x8x8xbf16>, vector<4x8x8xf32> -> vector<4x8x8xf32>
    %50 = tpu.transpose %49, [2, 0, 1] : vector<4x8x8xf32> -> vector<8x4x8xf32>
    "tpu.trace_stop"() : () -> ()
    %51 = vector.shape_cast %50 : vector<8x4x8xf32> to vector<8x32xf32>
    %52 = arith.truncf %51 : vector<8x32xf32> to vector<8x32xbf16>
    %cst_20 = arith.constant dense<0.000000e+00> : vector<8x32xf32>
    %53 = tpu.matmul %52, %5, %cst_20 {dimension_numbers = #tpu.dot_dimension_numbers<[1], [0], [0], [1], [0, 0, 1, 1], [], []>} : vector<8x32xbf16>, vector<32x32xbf16>, vector<8x32xf32> -> vector<8x32xf32>
    %54 = vector.broadcast %12 : vector<1x32xf32> to vector<8x32xf32>
    %55 = arith.addf %53, %54 : vector<8x32xf32>
    %56 = arith.addf %1, %55 : vector<8x32xf32>
    %cst_21 = arith.constant dense<0.000000e+00> : vector<8xf32>
    %57 = vector.multi_reduction <add>, %56, %cst_21 [1] : vector<8x32xf32> to vector<8xf32>
    %58 = vector.shape_cast %57 : vector<8xf32> to vector<8x1xf32>
    %cst_22 = arith.constant 3.200000e+01 : f32
    %59 = vector.broadcast %cst_22 : f32 to vector<8x1xf32>
    %60 = arith.divf %58, %59 : vector<8x1xf32>
    %61 = vector.broadcast %60 : vector<8x1xf32> to vector<8x32xf32>
    %62 = arith.subf %56, %61 : vector<8x32xf32>
    %63 = arith.mulf %62, %62 : vector<8x32xf32>
    %cst_23 = arith.constant dense<0.000000e+00> : vector<8xf32>
    %64 = vector.multi_reduction <add>, %63, %cst_23 [1] : vector<8x32xf32> to vector<8xf32>
    %65 = vector.shape_cast %64 : vector<8xf32> to vector<8x1xf32>
    %cst_24 = arith.constant 3.200000e+01 : f32
    %66 = vector.broadcast %cst_24 : f32 to vector<8x1xf32>
    %67 = arith.divf %65, %66 : vector<8x1xf32>
    %68 = vector.broadcast %60 : vector<8x1xf32> to vector<8x32xf32>
    %69 = arith.subf %56, %68 : vector<8x32xf32>
    %cst_25 = arith.constant 9.99999974E-6 : f32
    %70 = vector.broadcast %cst_25 : f32 to vector<8x1xf32>
    %71 = arith.addf %67, %70 : vector<8x1xf32>
    %72 = math.rsqrt %71 : vector<8x1xf32>
    %73 = vector.broadcast %72 : vector<8x1xf32> to vector<8x32xf32>
    %74 = arith.mulf %69, %73 : vector<8x32xf32>
    %75 = vector.broadcast %15 : vector<1x32xf32> to vector<8x32xf32>
    %76 = arith.mulf %74, %75 : vector<8x32xf32>
    %77 = vector.broadcast %16 : vector<1x32xf32> to vector<8x32xf32>
    %78 = arith.addf %76, %77 : vector<8x32xf32>
    %79 = arith.truncf %78 : vector<8x32xf32> to vector<8x32xbf16>
    %cst_26 = arith.constant dense<0.000000e+00> : vector<8x64xf32>
    %80 = tpu.matmul %79, %6, %cst_26 {dimension_numbers = #tpu.dot_dimension_numbers<[1], [0], [0], [1], [0, 0, 1, 1], [], []>} : vector<8x32xbf16>, vector<32x64xbf16>, vector<8x64xf32> -> vector<8x64xf32>
    %81 = vector.broadcast %13 : vector<1x64xf32> to vector<8x64xf32>
    %82 = arith.addf %80, %81 : vector<8x64xf32>
    %cst_27 = arith.constant 0.000000e+00 : f32
    %83 = vector.broadcast %cst_27 : f32 to vector<8x64xf32>
    %84 = arith.maximumf %82, %83 : vector<8x64xf32>
    %85 = arith.truncf %84 : vector<8x64xf32> to vector<8x64xbf16>
    %cst_28 = arith.constant dense<0.000000e+00> : vector<8x32xf32>
    %86 = tpu.matmul %85, %7, %cst_28 {dimension_numbers = #tpu.dot_dimension_numbers<[1], [0], [0], [1], [0, 0, 1, 1], [], []>} : vector<8x64xbf16>, vector<64x32xbf16>, vector<8x32xf32> -> vector<8x32xf32>
    %87 = vector.broadcast %14 : vector<1x32xf32> to vector<8x32xf32>
    %88 = arith.addf %86, %87 : vector<8x32xf32>
    %89 = arith.addf %78, %88 : vector<8x32xf32>
    %cst_29 = arith.constant dense<0.000000e+00> : vector<8xf32>
    %90 = vector.multi_reduction <add>, %89, %cst_29 [1] : vector<8x32xf32> to vector<8xf32>
    %91 = vector.shape_cast %90 : vector<8xf32> to vector<8x1xf32>
    %cst_30 = arith.constant 3.200000e+01 : f32
    %92 = vector.broadcast %cst_30 : f32 to vector<8x1xf32>
    %93 = arith.divf %91, %92 : vector<8x1xf32>
    %94 = vector.broadcast %93 : vector<8x1xf32> to vector<8x32xf32>
    %95 = arith.subf %89, %94 : vector<8x32xf32>
    %96 = arith.mulf %95, %95 : vector<8x32xf32>
    %cst_31 = arith.constant dense<0.000000e+00> : vector<8xf32>
    %97 = vector.multi_reduction <add>, %96, %cst_31 [1] : vector<8x32xf32> to vector<8xf32>
    %98 = vector.shape_cast %97 : vector<8xf32> to vector<8x1xf32>
    %cst_32 = arith.constant 3.200000e+01 : f32
    %99 = vector.broadcast %cst_32 : f32 to vector<8x1xf32>
    %100 = arith.divf %98, %99 : vector<8x1xf32>
    %101 = vector.broadcast %93 : vector<8x1xf32> to vector<8x32xf32>
    %102 = arith.subf %89, %101 : vector<8x32xf32>
    %cst_33 = arith.constant 9.99999974E-6 : f32
    %103 = vector.broadcast %cst_33 : f32 to vector<8x1xf32>
    %104 = arith.addf %100, %103 : vector<8x1xf32>
    %105 = math.rsqrt %104 : vector<8x1xf32>
    %106 = vector.broadcast %105 : vector<8x1xf32> to vector<8x32xf32>
    %107 = arith.mulf %102, %106 : vector<8x32xf32>
    %108 = vector.broadcast %17 : vector<1x32xf32> to vector<8x32xf32>
    %109 = arith.mulf %107, %108 : vector<8x32xf32>
    %110 = vector.broadcast %18 : vector<1x32xf32> to vector<8x32xf32>
    %111 = arith.addf %109, %110 : vector<8x32xf32>
    %c0_34 = arith.constant 0 : index
    %c0_35 = arith.constant 0 : index
    %112 = vector.load %arg8[%c0_34, %c0_35] : memref<32x32xbf16, #tpu.memory_space<vmem>>, vector<32x32xbf16>
    %c0_36 = arith.constant 0 : index
    %c0_37 = arith.constant 0 : index
    %113 = vector.load %arg9[%c0_36, %c0_37] : memref<32x64xbf16, #tpu.memory_space<vmem>>, vector<32x64xbf16>
    %c0_38 = arith.constant 0 : index
    %c0_39 = arith.constant 0 : index
    %114 = vector.load %arg10[%c0_38, %c0_39] : memref<32x32xbf16, #tpu.memory_space<vmem>>, vector<32x32xbf16>
    %c0_40 = arith.constant 0 : index
    %c0_41 = arith.constant 0 : index
    %115 = vector.load %arg11[%c0_40, %c0_41] : memref<32x64xbf16, #tpu.memory_space<vmem>>, vector<32x64xbf16>
    %c0_42 = arith.constant 0 : index
    %c0_43 = arith.constant 0 : index
    %116 = vector.load %arg12[%c0_42, %c0_43] : memref<64x32xbf16, #tpu.memory_space<vmem>>, vector<64x32xbf16>
    %c0_44 = arith.constant 0 : index
    %c0_45 = arith.constant 0 : index
    %117 = vector.load %arg13[%c0_44, %c0_45] : memref<10x64xf32, #tpu.memory_space<vmem>>, vector<10x64xf32>
    %118 = vector.extract_strided_slice %117 {offsets = [0, 0], sizes = [1, 32], strides = [1, 1]} : vector<10x64xf32> to vector<1x32xf32>
    %119 = vector.extract_strided_slice %117 {offsets = [1, 0], sizes = [1, 32], strides = [1, 1]} : vector<10x64xf32> to vector<1x32xf32>
    %120 = vector.extract_strided_slice %117 {offsets = [2, 0], sizes = [1, 32], strides = [1, 1]} : vector<10x64xf32> to vector<1x32xf32>
    %121 = vector.extract_strided_slice %117 {offsets = [3, 0], sizes = [1, 32], strides = [1, 1]} : vector<10x64xf32> to vector<1x32xf32>
    %122 = vector.extract_strided_slice %117 {offsets = [4, 0], sizes = [1, 64], strides = [1, 1]} : vector<10x64xf32> to vector<1x64xf32>
    %123 = vector.extract_strided_slice %117 {offsets = [5, 0], sizes = [1, 32], strides = [1, 1]} : vector<10x64xf32> to vector<1x32xf32>
    %124 = vector.extract_strided_slice %117 {offsets = [6, 0], sizes = [1, 32], strides = [1, 1]} : vector<10x64xf32> to vector<1x32xf32>
    %125 = vector.extract_strided_slice %117 {offsets = [7, 0], sizes = [1, 32], strides = [1, 1]} : vector<10x64xf32> to vector<1x32xf32>
    %126 = vector.extract_strided_slice %117 {offsets = [8, 0], sizes = [1, 32], strides = [1, 1]} : vector<10x64xf32> to vector<1x32xf32>
    %127 = vector.extract_strided_slice %117 {offsets = [9, 0], sizes = [1, 32], strides = [1, 1]} : vector<10x64xf32> to vector<1x32xf32>
    %128 = arith.truncf %111 : vector<8x32xf32> to vector<8x32xbf16>
    %cst_46 = arith.constant dense<0.000000e+00> : vector<8x32xf32>
    %129 = tpu.matmul %128, %112, %cst_46 {dimension_numbers = #tpu.dot_dimension_numbers<[1], [0], [0], [1], [0, 0, 1, 1], [], []>} : vector<8x32xbf16>, vector<32x32xbf16>, vector<8x32xf32> -> vector<8x32xf32>
    %130 = vector.broadcast %118 : vector<1x32xf32> to vector<8x32xf32>
    %131 = arith.addf %129, %130 : vector<8x32xf32>
    %132 = arith.truncf %131 : vector<8x32xf32> to vector<8x32xbf16>
    %133 = arith.truncf %3 : vector<16x32xf32> to vector<16x32xbf16>
    %cst_47 = arith.constant dense<0.000000e+00> : vector<16x64xf32>
    %134 = tpu.matmul %133, %113, %cst_47 {dimension_numbers = #tpu.dot_dimension_numbers<[1], [0], [0], [1], [0, 0, 1, 1], [], []>} : vector<16x32xbf16>, vector<32x64xbf16>, vector<16x64xf32> -> vector<16x64xf32>
    %135 = vector.extract_strided_slice %134 {offsets = [0, 0], sizes = [16, 32], strides = [1, 1]} : vector<16x64xf32> to vector<16x32xf32>
    %136 = vector.broadcast %119 : vector<1x32xf32> to vector<16x32xf32>
    %137 = arith.addf %135, %136 : vector<16x32xf32>
    %138 = arith.truncf %137 : vector<16x32xf32> to vector<16x32xbf16>
    %139 = vector.extract_strided_slice %134 {offsets = [0, 32], sizes = [16, 32], strides = [1, 1]} : vector<16x64xf32> to vector<16x32xf32>
    %140 = vector.broadcast %120 : vector<1x32xf32> to vector<16x32xf32>
    %141 = arith.addf %139, %140 : vector<16x32xf32>
    %142 = arith.truncf %141 : vector<16x32xf32> to vector<16x32xbf16>
    %143 = vector.shape_cast %132 : vector<8x32xbf16> to vector<8x4x8xbf16>
    %144 = vector.shape_cast %138 : vector<16x32xbf16> to vector<16x4x8xbf16>
    %145 = vector.shape_cast %142 : vector<16x32xbf16> to vector<16x4x8xbf16>
    "tpu.trace_start"() <{level = 10 : i32, message = "qhd,khd->hqk"}> : () -> ()
    %cst_48 = arith.constant dense<0.000000e+00> : vector<4x8x16xf32>
    %146 = tpu.matmul %143, %144, %cst_48 {dimension_numbers = #tpu.dot_dimension_numbers<[2], [2], [0], [0], [0, 1, 0, 0, 1, 0], [1], [1]>} : vector<8x4x8xbf16>, vector<16x4x8xbf16>, vector<4x8x16xf32> -> vector<4x8x16xf32>
    "tpu.trace_stop"() : () -> ()
    %cst_49 = arith.constant 0.353553385 : f32
    %147 = vector.broadcast %cst_49 : f32 to vector<4x8x16xf32>
    %148 = arith.mulf %146, %147 : vector<4x8x16xf32>
    %cst_50 = arith.constant dense<0xFF800000> : vector<4x8xf32>
    %149 = vector.multi_reduction <maximumf>, %148, %cst_50 [2] : vector<4x8x16xf32> to vector<4x8xf32>
    %150 = vector.shape_cast %149 : vector<4x8xf32> to vector<4x8x1xf32>
    %151 = vector.broadcast %150 : vector<4x8x1xf32> to vector<4x8x16xf32>
    %152 = arith.subf %148, %151 : vector<4x8x16xf32>
    %153 = math.exp %152 : vector<4x8x16xf32>
    %cst_51 = arith.constant dense<0.000000e+00> : vector<4x8xf32>
    %154 = vector.multi_reduction <add>, %153, %cst_51 [2] : vector<4x8x16xf32> to vector<4x8xf32>
    %155 = vector.shape_cast %154 : vector<4x8xf32> to vector<4x8x1xf32>
    %156 = vector.broadcast %155 : vector<4x8x1xf32> to vector<4x8x16xf32>
    %157 = arith.divf %153, %156 : vector<4x8x16xf32>
    %158 = arith.truncf %157 : vector<4x8x16xf32> to vector<4x8x16xbf16>
    "tpu.trace_start"() <{level = 10 : i32, message = "hqk,khd->qhd"}> : () -> ()
    %cst_52 = arith.constant dense<0.000000e+00> : vector<4x8x8xf32>
    %159 = tpu.matmul %145, %158, %cst_52 {dimension_numbers = #tpu.dot_dimension_numbers<[0], [2], [2], [1], [0, 1, 0, 2, 1, 1], [1], [0]>} : vector<16x4x8xbf16>, vector<4x8x16xbf16>, vector<4x8x8xf32> -> vector<4x8x8xf32>
    %160 = tpu.transpose %159, [2, 0, 1] : vector<4x8x8xf32> -> vector<8x4x8xf32>
    "tpu.trace_stop"() : () -> ()
    %161 = vector.shape_cast %160 : vector<8x4x8xf32> to vector<8x32xf32>
    %162 = arith.truncf %161 : vector<8x32xf32> to vector<8x32xbf16>
    %cst_53 = arith.constant dense<0.000000e+00> : vector<8x32xf32>
    %163 = tpu.matmul %162, %114, %cst_53 {dimension_numbers = #tpu.dot_dimension_numbers<[1], [0], [0], [1], [0, 0, 1, 1], [], []>} : vector<8x32xbf16>, vector<32x32xbf16>, vector<8x32xf32> -> vector<8x32xf32>
    %164 = vector.broadcast %121 : vector<1x32xf32> to vector<8x32xf32>
    %165 = arith.addf %163, %164 : vector<8x32xf32>
    %166 = arith.addf %111, %165 : vector<8x32xf32>
    %cst_54 = arith.constant dense<0.000000e+00> : vector<8xf32>
    %167 = vector.multi_reduction <add>, %166, %cst_54 [1] : vector<8x32xf32> to vector<8xf32>
    %168 = vector.shape_cast %167 : vector<8xf32> to vector<8x1xf32>
    %cst_55 = arith.constant 3.200000e+01 : f32
    %169 = vector.broadcast %cst_55 : f32 to vector<8x1xf32>
    %170 = arith.divf %168, %169 : vector<8x1xf32>
    %171 = vector.broadcast %170 : vector<8x1xf32> to vector<8x32xf32>
    %172 = arith.subf %166, %171 : vector<8x32xf32>
    %173 = arith.mulf %172, %172 : vector<8x32xf32>
    %cst_56 = arith.constant dense<0.000000e+00> : vector<8xf32>
    %174 = vector.multi_reduction <add>, %173, %cst_56 [1] : vector<8x32xf32> to vector<8xf32>
    %175 = vector.shape_cast %174 : vector<8xf32> to vector<8x1xf32>
    %cst_57 = arith.constant 3.200000e+01 : f32
    %176 = vector.broadcast %cst_57 : f32 to vector<8x1xf32>
    %177 = arith.divf %175, %176 : vector<8x1xf32>
    %178 = vector.broadcast %170 : vector<8x1xf32> to vector<8x32xf32>
    %179 = arith.subf %166, %178 : vector<8x32xf32>
    %cst_58 = arith.constant 9.99999974E-6 : f32
    %180 = vector.broadcast %cst_58 : f32 to vector<8x1xf32>
    %181 = arith.addf %177, %180 : vector<8x1xf32>
    %182 = math.rsqrt %181 : vector<8x1xf32>
    %183 = vector.broadcast %182 : vector<8x1xf32> to vector<8x32xf32>
    %184 = arith.mulf %179, %183 : vector<8x32xf32>
    %185 = vector.broadcast %124 : vector<1x32xf32> to vector<8x32xf32>
    %186 = arith.mulf %184, %185 : vector<8x32xf32>
    %187 = vector.broadcast %125 : vector<1x32xf32> to vector<8x32xf32>
    %188 = arith.addf %186, %187 : vector<8x32xf32>
    %189 = arith.truncf %188 : vector<8x32xf32> to vector<8x32xbf16>
    %cst_59 = arith.constant dense<0.000000e+00> : vector<8x64xf32>
    %190 = tpu.matmul %189, %115, %cst_59 {dimension_numbers = #tpu.dot_dimension_numbers<[1], [0], [0], [1], [0, 0, 1, 1], [], []>} : vector<8x32xbf16>, vector<32x64xbf16>, vector<8x64xf32> -> vector<8x64xf32>
    %191 = vector.broadcast %122 : vector<1x64xf32> to vector<8x64xf32>
    %192 = arith.addf %190, %191 : vector<8x64xf32>
    %cst_60 = arith.constant 0.000000e+00 : f32
    %193 = vector.broadcast %cst_60 : f32 to vector<8x64xf32>
    %194 = arith.maximumf %192, %193 : vector<8x64xf32>
    %195 = arith.truncf %194 : vector<8x64xf32> to vector<8x64xbf16>
    %cst_61 = arith.constant dense<0.000000e+00> : vector<8x32xf32>
    %196 = tpu.matmul %195, %116, %cst_61 {dimension_numbers = #tpu.dot_dimension_numbers<[1], [0], [0], [1], [0, 0, 1, 1], [], []>} : vector<8x64xbf16>, vector<64x32xbf16>, vector<8x32xf32> -> vector<8x32xf32>
    %197 = vector.broadcast %123 : vector<1x32xf32> to vector<8x32xf32>
    %198 = arith.addf %196, %197 : vector<8x32xf32>
    %199 = arith.addf %188, %198 : vector<8x32xf32>
    %cst_62 = arith.constant dense<0.000000e+00> : vector<8xf32>
    %200 = vector.multi_reduction <add>, %199, %cst_62 [1] : vector<8x32xf32> to vector<8xf32>
    %201 = vector.shape_cast %200 : vector<8xf32> to vector<8x1xf32>
    %cst_63 = arith.constant 3.200000e+01 : f32
    %202 = vector.broadcast %cst_63 : f32 to vector<8x1xf32>
    %203 = arith.divf %201, %202 : vector<8x1xf32>
    %204 = vector.broadcast %203 : vector<8x1xf32> to vector<8x32xf32>
    %205 = arith.subf %199, %204 : vector<8x32xf32>
    %206 = arith.mulf %205, %205 : vector<8x32xf32>
    %cst_64 = arith.constant dense<0.000000e+00> : vector<8xf32>
    %207 = vector.multi_reduction <add>, %206, %cst_64 [1] : vector<8x32xf32> to vector<8xf32>
    %208 = vector.shape_cast %207 : vector<8xf32> to vector<8x1xf32>
    %cst_65 = arith.constant 3.200000e+01 : f32
    %209 = vector.broadcast %cst_65 : f32 to vector<8x1xf32>
    %210 = arith.divf %208, %209 : vector<8x1xf32>
    %211 = vector.broadcast %203 : vector<8x1xf32> to vector<8x32xf32>
    %212 = arith.subf %199, %211 : vector<8x32xf32>
    %cst_66 = arith.constant 9.99999974E-6 : f32
    %213 = vector.broadcast %cst_66 : f32 to vector<8x1xf32>
    %214 = arith.addf %210, %213 : vector<8x1xf32>
    %215 = math.rsqrt %214 : vector<8x1xf32>
    %216 = vector.broadcast %215 : vector<8x1xf32> to vector<8x32xf32>
    %217 = arith.mulf %212, %216 : vector<8x32xf32>
    %218 = vector.broadcast %126 : vector<1x32xf32> to vector<8x32xf32>
    %219 = arith.mulf %217, %218 : vector<8x32xf32>
    %220 = vector.broadcast %127 : vector<1x32xf32> to vector<8x32xf32>
    %221 = arith.addf %219, %220 : vector<8x32xf32>
    %c0_67 = arith.constant 0 : index
    %c0_68 = arith.constant 0 : index
    %c0_69 = arith.constant 0 : index
    %222 = vector.load %arg14[%c0_67, %c0_68, %c0_69] : memref<1x8x32xf32, #tpu.memory_space<vmem>>, vector<1x8x32xf32>
    %223 = vector.shape_cast %222 : vector<1x8x32xf32> to vector<8x32xf32>
    %224 = vector.shape_cast %221 : vector<8x32xf32> to vector<1x8x32xf32>
    tpu.vector_store %arg14[%c0_67, %c0_68, %c0_69], %224 {strides = array<i32>} : memref<1x8x32xf32, #tpu.memory_space<vmem>>, vector<1x8x32xf32>,
    return
  }
  func.func @transform_0(%arg0: i32) -> (i32, i32, i32) {
    %c0_i32 = arith.constant 0 : i32
    %c0_i32_0 = arith.constant 0 : i32
    %c0_i32_1 = arith.constant 0 : i32
    return %arg0, %c0_i32, %c0_i32_0 : i32, i32, i32
  }
  func.func @transform_1(%arg0: i32) -> (i32, i32, i32) {
    %c0_i32 = arith.constant 0 : i32
    %c0_i32_0 = arith.constant 0 : i32
    %c0_i32_1 = arith.constant 0 : i32
    return %arg0, %c0_i32, %c0_i32_0 : i32, i32, i32
  }
  func.func @transform_2(%arg0: i32) -> (i32, i32) {
    %c0_i32 = arith.constant 0 : i32
    %c0_i32_0 = arith.constant 0 : i32
    %c0_i32_1 = arith.constant 0 : i32
    return %c0_i32, %c0_i32_0 : i32, i32
  }
  func.func @transform_3(%arg0: i32) -> (i32, i32) {
    %c0_i32 = arith.constant 0 : i32
    %c0_i32_0 = arith.constant 0 : i32
    %c0_i32_1 = arith.constant 0 : i32
    return %c0_i32, %c0_i32_0 : i32, i32
  }
  func.func @transform_4(%arg0: i32) -> (i32, i32) {
    %c0_i32 = arith.constant 0 : i32
    %c0_i32_0 = arith.constant 0 : i32
    %c0_i32_1 = arith.constant 0 : i32
    return %c0_i32, %c0_i32_0 : i32, i32
  }
  func.func @transform_5(%arg0: i32) -> (i32, i32) {
    %c0_i32 = arith.constant 0 : i32
    %c0_i32_0 = arith.constant 0 : i32
    %c0_i32_1 = arith.constant 0 : i32
    return %c0_i32, %c0_i32_0 : i32, i32
  }
  func.func @transform_6(%arg0: i32) -> (i32, i32) {
    %c0_i32 = arith.constant 0 : i32
    %c0_i32_0 = arith.constant 0 : i32
    %c0_i32_1 = arith.constant 0 : i32
    return %c0_i32, %c0_i32_0 : i32, i32
  }
  func.func @transform_7(%arg0: i32) -> (i32, i32) {
    %c0_i32 = arith.constant 0 : i32
    %c0_i32_0 = arith.constant 0 : i32
    %c0_i32_1 = arith.constant 0 : i32
    return %c0_i32, %c0_i32_0 : i32, i32
  }
  func.func @transform_8(%arg0: i32) -> (i32, i32) {
    %c0_i32 = arith.constant 0 : i32
    %c0_i32_0 = arith.constant 0 : i32
    %c0_i32_1 = arith.constant 0 : i32
    return %c0_i32, %c0_i32_0 : i32, i32
  }
  func.func @transform_9(%arg0: i32) -> (i32, i32) {
    %c0_i32 = arith.constant 0 : i32
    %c0_i32_0 = arith.constant 0 : i32
    %c0_i32_1 = arith.constant 0 : i32
    return %c0_i32, %c0_i32_0 : i32, i32
  }
  func.func @transform_10(%arg0: i32) -> (i32, i32) {
    %c0_i32 = arith.constant 0 : i32
    %c0_i32_0 = arith.constant 0 : i32
    %c0_i32_1 = arith.constant 0 : i32
    return %c0_i32, %c0_i32_0 : i32, i32
  }
  func.func @transform_11(%arg0: i32) -> (i32, i32) {
    %c0_i32 = arith.constant 0 : i32
    %c0_i32_0 = arith.constant 0 : i32
    %c0_i32_1 = arith.constant 0 : i32
    return %c0_i32, %c0_i32_0 : i32, i32
  }
  func.func @transform_12(%arg0: i32) -> (i32, i32) {
    %c0_i32 = arith.constant 0 : i32
    %c0_i32_0 = arith.constant 0 : i32
    %c0_i32_1 = arith.constant 0 : i32
    return %c0_i32, %c0_i32_0 : i32, i32
  }
  func.func @transform_13(%arg0: i32) -> (i32, i32, i32) {
    %c0_i32 = arith.constant 0 : i32
    %c0_i32_0 = arith.constant 0 : i32
    %c0_i32_1 = arith.constant 0 : i32
    return %arg0, %c0_i32, %c0_i32_0 : i32, i32, i32
  }
}

</mosaic_0001>

<bundles_post_ra>
// kernel: tpu_custom_call.1
= control target key start
LH: loop header
LB: loop body
LE: loop exit
PB: predicated region body
PF: predicated region fallthrough
CT: control target
= control target key end

     0   :  { %18 = vsyncpa [#allocation3], 0  ;;  %s4558_s0 = inlined_call_operand.vmem [shape: f32[2,8,32], index: 0, kind: input, shape index: {}]   ;;  %s4559_s1 = inlined_call_operand.vmem [shape: f32[2,16,32], index: 1, kind: input, shape index: {}]   ;;  %s4560_s2 = inlined_call_operand.vmem [shape: bf16[32,96], index: 2, kind: input, shape index: {}]   ;;  %s4561_s3 = inlined_call_operand.vmem [shape: bf16[32,32], index: 3, kind: input, shape index: {}]   ;;  %s4562_s4 = inlined_call_operand.hbm [shape: bf16[32,64], index: 4, kind: input, shape index: {}]   ;;  %s4563_s5 = inlined_call_operand.vmem [shape: bf16[64,32], index: 5, kind: input, shape index: {}]   ;;  %s4564_s6 = inlined_call_operand.hbm [shape: f32[10,64], index: 6, kind: input, shape index: {}]   ;;  %s4565_s7 = inlined_call_operand.hbm [shape: bf16[32,32], index: 7, kind: input, shape index: {}]   ;;  %s4566_s8 = inlined_call_operand.hbm [shape: bf16[32,64], index: 8, kind: input, shape index: {}]   ;;  %s4567_s9 = inlined_call_operand.vmem [shape: bf16[32,32], index: 9, kind: input, shape index: {}]   ;;  %s4568_s10 = inlined_call_operand.hbm [shape: bf16[32,64], index: 10, kind: input, shape index: {}]   ;;  %s4569_s11 = inlined_call_operand.vmem [shape: bf16[64,32], index: 11, kind: input, shape index: {}]   ;;  %s4570_s12 = inlined_call_operand.hbm [shape: f32[10,64], index: 12, kind: input, shape index: {}]   ;;  %s4571_s13 = inlined_call_operand.hbm [shape: f32[2,8,32], index: 13, kind: output, shape index: {}]  }
   0x1   :  { %19 = vsyncpa [#allocation6], 0 }
   0x2   :  { %20 = vsyncpa [#allocation9], 0 }
   0x3   :  { %21 = vsyncpa [#allocation12], 0 }
   0x4   :  { %22 = vsyncpa [#allocation4], 0 }
   0x5   :  { %24 = vsyncpa [#allocation4 + $0x1], 0  ;;  %s4007_s25 = smov 0   ;;  %s4009_s26 = smov 0  }
   0x6   :  { %s4011_s27 = smov 0   ;;  %s4013_s28 = smov 0  }
   0x7 LB: > { %4581 = sst [smem:[#allocation19_spill]] %s3899_s25  ;;  %s4028_s29 = sadd.s32 4294967295, %s3911_s28   ;;  %s3911_s28 = sphi %s4013_s28, %s4605_s28   ;;  %s3907_s27 = sphi %s4011_s27, %s4607_s27   ;;  %s3903_s26 = sphi %s4009_s26, %s4609_s26   ;;  %s3899_s25 = sphi %s4007_s25, %s4608_s25  }
   0x8   : > { %4582 = sst [smem:[#allocation20_spill]] %s3907_s27  ;;  %s3184_s30 = sadd.s32 4294967294, %s3911_s28  }
   0x9   : > { %4583 = sst [smem:[#allocation21_spill]] %s3911_s28  ;;  %s4032_s14 = sadd.s32 1, %s3911_s28  }
   0xa   : > { %4584 = sst [smem:[#allocation22_spill]] %s4032_s14  ;;  %s320_s15 = sadd.s32 1, %s3907_s27 }
   0xb   : > { %s317_s16 = ssub.s32 %s3911_s28, %s4032_s14  ;;  %p330_p0 = scmp.ne.s32.totalorder %s3907_s27, %s3903_s26 }
   0xc   : > { %p318_p1 = scmp.eq.s32.totalorder %s317_s16, 0  ;;  %p331_p2 = scmp.eq.s32.totalorder %s4028_s29, 1 }
   0xd   : > { %p336_p3 = scmp.ne.s32.totalorder %s3903_s26, %s3899_s25  ;;  %p337_p4 = scmp.eq.s32.totalorder %s3184_s30, 1 }
   0xe   : > { %s4043_s17 = scalar_select %p318_p1, %s3907_s27, %s320_s15  }
   0xf   : > { %p4045_p5 = por %p331_p2, %p330_p0  ;;  %p4049_p6 = por %p337_p4, %p336_p3 }
  0x10   : > { %4585 = sst [smem:[#allocation23_spill]] %s4043_s17  ;;  %p3185_p7 = scmp.ge.s32.totalorder %s3911_s28, 1 }
  0x11   : > { %s4587_s19 = scalar_select %p4049_p6, 1, 0 }
  0x12   : > { %p344_p8 = scmp.lt.s32.totalorder %s3911_s28, 3  ;;  %p4580_p9 = scmp.eq.s32.totalorder %s4028_s29, 0 }
  0x13   : > { %4588 = sst [smem:[#allocation24_spill]] %s4587_s19  ;;  %s3913_s21 = smov [#allocation5]  }
  0x14   : > { %p4056_p10 = pnand %p3185_p7, %p344_p8  ;;  %s378_s22 = sshll.u32 %s3913_s21, 4  ;;  %s379_s22 = int_to_ptr.vmem [resolvable:$true] %s378_s22 }
  0x15   : > { %s3914_s24 = smov [#allocation8]   ;;  %s3690_s16 = scalar_lea.vmem %s379_s22, 256 }
  0x16   : > { %p3525_p11 = pneg %p4056_p10  ;;  %s404_s30 = sshll.u32 %s3914_s24, 4  ;;  %s405_s30 = int_to_ptr.vmem [resolvable:$true] %s404_s30 }
  0x17   : > { %p3691_p0 = scmp.ne.s32.totalorder %s379_s22, %s3690_s16  ;;  %p3698_p3 = scmp.lt.s32.totalorder %s379_s22, %s379_s22 }
  0x18   : > { %p4064_p12 = pnand %p4580_p9, %p3525_p11  ;;  %p3699_p4 = scmp.lt.s32.totalorder %s3690_s16, %s3690_s16 }
  0x1a   : > { %p4070_p13 = pneg %p4064_p12  ;;  %p3700_p7 = por %p3699_p4, %p3698_p3 }
  0x1c   : > { %p3693_p1 = pnand %p3691_p0, %p4070_p13 }
  0x1e   : > { %p3694_p2 = pneg %p3693_p1 }
  0x20   : > { %p3701_p8 = pnand %p3700_p7, %p3694_p2 }
  0x22   : > { %3704 = shalt.err (!%p3701_p8)
}
  0x23   : > { %s4578_s21 = smov 128   ;;  %s4579_s24 = smov 8  }
  0x24   : > { %3531 = dma.hbm_to_vmem [thread:$0]  (!%p4064_p12), %s4564_s6, 256, %s379_s22, [#allocation6], %s4578_s21, %s4578_s21, %s4579_s24  }
  0x25   : > { %s3917_s14 = smov [#allocation2]   ;;  %s3716_s25 = scalar_lea.vmem %s405_s30, 256 }
  0x26   : > { %s362_s19 = sshll.u32 %s3917_s14, 4  ;;  %p3717_p11 = scmp.ne.s32.totalorder %s405_s30, %s3716_s25  ;;  %s363_s19 = int_to_ptr.vmem [resolvable:$true] %s362_s19 }
  0x27   : > { %p3724_p2 = scmp.lt.s32.totalorder %s405_s30, %s405_s30  ;;  %p3725_p3 = scmp.lt.s32.totalorder %s3716_s25, %s3716_s25 }
  0x28   : > { %p3719_p0 = pnand %p3717_p11, %p4070_p13 }
  0x29   : > { %p3726_p4 = por %p3725_p3, %p3724_p2 }
  0x2a   : > { %p3720_p1 = pneg %p3719_p0 }
  0x2c   : > { %p3727_p7 = pnand %p3726_p4, %p3720_p1 }
  0x2e   : > { %3730 = shalt.err (!%p3727_p7)
}
  0x2f   : > { %s3918_s16 = smov 64   ;;  %s3919_s28 = smov 4  }
  0x30   : > { %3537 = dma.hbm_to_vmem [thread:$0]  (!%p4064_p12), %s4566_s8, 256, %s405_s30, [#allocation9], %s3918_s16, %s3918_s16, %s3919_s28  }
  0x31   : > { %s3742_s17 = scalar_lea.vmem %s363_s19, 256  ;;  %p3750_p1 = scmp.lt.s32.totalorder %s363_s19, %s363_s19 }
  0x32   : > { %p3743_p8 = scmp.ne.s32.totalorder %s363_s19, %s3742_s17  ;;  %p3751_p2 = scmp.lt.s32.totalorder %s3742_s17, %s3742_s17 }
  0x34   : > { %p3745_p11 = pnand %p3743_p8, %p4070_p13  ;;  %p3752_p3 = por %p3751_p2, %p3750_p1 }
  0x36   : > { %p3746_p0 = pneg %p3745_p11 }
  0x38   : > { %p3753_p4 = pnand %p3752_p3, %p3746_p0 }
  0x3a   : > { %3756 = shalt.err (!%p3753_p4)
}
  0x3b   : > { %3528 = dma.hbm_to_vmem [thread:$0]  (!%p4064_p12), %s4562_s4, 256, %s363_s19, [#allocation3], %s3918_s16, %s3918_s16, %s3919_s28  }
  0x3c   : > { %s3920_s30 = smov [#allocation7]   ;;  %s3921_s14 = smov [#allocation10]  }
  0x3d   : > { %s391_s27 = sshll.u32 %s3920_s30, 4  ;;  %s420_s21 = sshll.u32 %s3921_s14, 4  ;;  %s392_s27 = int_to_ptr.vmem [resolvable:$true] %s391_s27  ;;  %s421_s21 = int_to_ptr.vmem [resolvable:$true] %s420_s21 }
  0x3e   : > { %s3768_s24 = scalar_lea.vmem %s392_s27, 256  ;;  %p3776_p0 = scmp.lt.s32.totalorder %s392_s27, %s392_s27 }
  0x3f   : > { %p3769_p7 = scmp.ne.s32.totalorder %s392_s27, %s3768_s24  ;;  %p3777_p1 = scmp.lt.s32.totalorder %s3768_s24, %s3768_s24 }
  0x41   : > { %p3771_p8 = pnand %p3769_p7, %p4070_p13  ;;  %p3778_p2 = por %p3777_p1, %p3776_p0 }
  0x43   : > { %p3772_p11 = pneg %p3771_p8 }
  0x45   : > { %p3779_p3 = pnand %p3778_p2, %p3772_p11 }
  0x47   : > { %3782 = shalt.err (!%p3779_p3)
}
  0x48   : > { %3534 = dma.hbm_to_vmem [thread:$0]  (!%p4064_p12), %s4565_s7, 256, %s392_s27, [#allocation6], %s3918_s16, %s3918_s16, %s3919_s28  }
  0x49   : > { %s3794_s25 = scalar_lea.vmem %s421_s21, 256  ;;  %p3802_p9 = scmp.lt.s32.totalorder %s421_s21, %s421_s21 }
  0x4a   : > { %p3795_p4 = scmp.ne.s32.totalorder %s421_s21, %s3794_s25  ;;  %p3803_p0 = scmp.lt.s32.totalorder %s3794_s25, %s3794_s25 }
  0x4c   : > { %p3797_p7 = pnand %p3795_p4, %p4070_p13  ;;  %p3804_p11 = por %p3803_p0, %p3802_p9 }
  0x4e   : > { %p3798_p8 = pneg %p3797_p7 }
  0x50   : > { %p3805_p1 = pnand %p3804_p11, %p3798_p8 }
  0x52   : > { %3808 = shalt.err (!%p3805_p1)
}
  0x53   : > { %3540 = dma.hbm_to_vmem [thread:$0]  (!%p4064_p12), %s4568_s10, 256, %s421_s21, [#allocation9], %s3918_s16, %s3918_s16, %s3919_s28  }
  0x54   : > { %s3922_s30 = smov [#allocation11]  }
  0x55   : > { %s436_s27 = sshll.u32 %s3922_s30, 4  ;;  %s437_s27 = int_to_ptr.vmem [resolvable:$true] %s436_s27 }
  0x56   : > { %s3820_s14 = scalar_lea.vmem %s437_s27, 256  ;;  %p3828_p4 = scmp.lt.s32.totalorder %s437_s27, %s437_s27 }
  0x57   : > { %p3821_p2 = scmp.ne.s32.totalorder %s437_s27, %s3820_s14  ;;  %p3829_p7 = scmp.lt.s32.totalorder %s3820_s14, %s3820_s14 }
  0x59   : > { %p3823_p3 = pnand %p3821_p2, %p4070_p13  ;;  %p3830_p8 = por %p3829_p7, %p3828_p4 }
  0x5b   : > { %p3824_p9 = pneg %p3823_p3 }
  0x5d   : > { %p3831_p0 = pnand %p3830_p8, %p3824_p9 }
  0x5f   : > { %3834 = shalt.err (!%p3831_p0)
}
  0x60   : > { %s4592_s19 = smov 8   ;;  %s4593_s17 = smov 128  }
  0x61   : > { %3543 = dma.hbm_to_vmem [thread:$0]  (!%p4064_p12), %s4570_s12, 256, %s437_s27, [#allocation12], %s4593_s17, %s4593_s17, %s4592_s19  }
  0x62   : > { %467 = sbr.rel (%p4056_p10) target bundleno = 5646 (0x160e), region = 72  ;;  %p4594_p13 = scmp.eq.s32.totalorder (!%p4056_p10), %s4028_s29, 0 }
  0x67   : > { %3878 = dma.done.wait (%p4594_p13), [#allocation3], 256   ;;  %p4595_p11 = pmov %p4594_p13 }
  0x69   : > { %3880 = vsyncadd (%p4595_p11), [#allocation3], 4294967040  ;;  %p4596_p1 = pmov %p4595_p11 }
  0x6b   : > { %3882 = dma.done.wait (%p4596_p1), [#allocation6], 512   ;;  %p4597_p2 = pmov %p4596_p1 }
  0x6c   : > { %p4598_p3 = pmov %p4596_p1 }
  0x6d   : > { %3884 = vsyncadd (%p4597_p2), [#allocation6], 4294966784 }
  0x6e   : > { %3886 = dma.done.wait (%p4598_p3), [#allocation9], 512   ;;  %p4599_p12 = pmov %p4596_p1 }
  0x6f   : > { %p4600_p10 = pmov %p4596_p1 }
  0x70   : > { %3888 = vsyncadd (%p4599_p12), [#allocation9], 4294966784 }
  0x71   : > { %3890 = dma.done.wait (%p4600_p10), [#allocation12], 256   ;;  %p4601_p9 = pmov %p4596_p1 }
  0x72   : > { %p535_p4 = scmp.lt.s32.totalorder %s4028_s29, 1  ;;  %v627_v0 = vlaneseq  ;;  %v3923_v1 = vmov 0.0   ;;  %vm3924_vm0 = vmmov 0   ;;  %v3617_v4 = vld [vmem:[%s4560_s2 + $0x8] sm:$0xff]   ;;  %v3618_v5 = vld [vmem:[%s4560_s2] sm:$0xff]   ;;  %vm583_vm1 = vcmask 261120  }
  0x73   : > { %3892 = vsyncadd (%p4601_p9), [#allocation12], 4294967040  ;;  %3323 = vmatprep.subr.bf16.mxu0 %v3923_v1  ;;  %3327 = vmatprep.mubr.msk.bf16.mxu0 %vm3924_vm0, %v3923_v1  ;;  %v4179_v7 = vld [vmem:[#allocation5] sm:$0xff]  ;;  %s3925_s14 = smov 32   ;;  %s3926_s19 = smov 112   ;;  %vm754_vm2 = vcmask 1043456  }
  0x74   : > { %s4157_s20 = scalar_select %p535_p4, %s4028_s29, 1  ;;  %v4159_v2 = vshrl.u32 %v627_v0, 7  ;;  %3331 = vmatprep.subr.bf16.mxu1 %v3923_v1  ;;  %3333 = vmatprep.mubr.msk.bf16.mxu1 %vm3924_vm0, %v3923_v1  ;;  %vm750_vm3 = vcmask 64512   ;;  %vm1525_vm4 = vcmask 130048   ;;  %vm1527_vm5 = vcmask 195584  }
  0x75   : > { %3324 = vmatpush3.bf16.msra.mxu0 %v3617_v4  ;;  %s3927_s17 = smov 120   ;;  %s3928_s25 = smov 104   ;;  %vm1704_vm6 = vcmask 523264  }
  0x76   : > { %s3201_s23 = sshll.u32 %s4157_s20, 3  ;;  %v4169_v3 = vsub.s32 1, %v4159_v2  ;;  %3325 = vmatprep.subr.bf16.mxu0 %v3923_v1  ;;  %s3929_s28 = smov 96   ;;  %v4199_v17 = vsub.s32 0, %v4159_v2  ;;  %v645_v28 = vsub.s32 2, %v4159_v2 }
  0x77   : > { %s538_s16 = scalar_lea.vmem %s4558_s0, %s3201_s23  ;;  %s3930_s23 = smov 64  }
  0x78   : > { %v4177_v6 = vld [vmem:[%s538_s16] sm:$0xff]  ;;  %v636_v8 = vrot.slane %v4179_v7, %v4169_v3  ;;  %v630_v18 = vrot.slane %v4179_v7, %v4199_v17  ;;  %v646_v29 = vrot.slane %v4179_v7, %v645_v28  ;;  %s3933_s22 = smov 16   ;;  %s3934_s30 = smov 8  }
  0x79   : > { %v570_v9 = vpack.c.bf16 %v4177_v6, %v4177_v6  ;;  %3326 = vmatpush3.bf16.msra.mxu0 %v3618_v5  ;;  %s3935_s27 = smov 24   ;;  %s3259_s16 = sshll.u32 %s4157_s20, 4 }
  0x7a   : > { %638 = vrot.lane.b32.xlu0 %v636_v8, %s3925_s14  ;;  %3355 = vmatprep.subr.bf16.mxu0 %v3923_v1  ;;  %s543_s15 = scalar_lea.vmem %s4559_s1, %s3259_s16  ;;  %s3256_s20 = sshll.u32 %s4028_s29, 7 }
  0x7c   : > { %3328 = vmatmul.mubr.msk.bf16.vlgmr.msra.gmra.mxu0 %vm583_vm1, %v570_v9 }
  0x7d   : > { %3357 = vmatprep.mubr.msk.bf16.mxu0 %vm3924_vm0, %v3923_v1 }
  0xec   : > { %v639_v10 = vpop.permute.xlu0 %638 }
 0x13c   : > { %v4191_v11 = vpop.f32.mrf.mxu0 }
 0x13d   : > { %v641_v12 = vadd.f32 %v639_v10, %v4191_v11  ;;  %v631_v19 = vadd.f32 %v630_v18, %v4191_v11 }
 0x13e   : > { %v3329_v13 = vpop.f32.mrf.mxu0 }
 0x13f   : > { %v642_v14 = vpack.c.bf16 %v641_v12, %v641_v12  ;;  %v632_v22 = vpack.c.bf16 %v631_v19, %v631_v19 }
 0x140   : > { %v624_v15 = vpop.f32.mrf.mxu0 }
 0x141   : > { %663 = vrot.lane.b32.xlu1 %v642_v14, %s3926_s19  ;;  %661 = vrot.lane.b32.xlu0 %v642_v14, %s3927_s17 }
 0x142   : > { %v3330_v16 = vpop.f32.mrf.mxu0 }
 0x145   : > { %665 = vrot.lane.b32.xlu1 %v642_v14, %s3928_s25  ;;  %674 = vrot.lane.b32.xlu0 %v642_v14, %s3929_s28 }
 0x1b3   : > { %v664_v20 = vpop.permute.xlu1 %663  ;;  %v662_v21 = vpop.permute.xlu0 %661 }
 0x1b4   : > { %678 = vrot.lane.b32.xlu0 %v664_v20, %s3929_s28  ;;  %676 = vrot.lane.b32.xlu1 %v662_v21, %s3929_s28 }
 0x1b7   : > { %v666_v23 = vpop.permute.xlu1 %665  ;;  %v675_v24 = vpop.permute.xlu0 %674 }
 0x1b8   : > { %680 = vrot.lane.b32.xlu1 %v666_v23, %s3929_s28  ;;  %654 = vrot.lane.b32.xlu0 %v632_v22, %s3927_s17 }
 0x1bc   : > { %656 = vrot.lane.b32.xlu1 %v632_v22, %s3926_s19 }
 0x1c0   : > { %658 = vrot.lane.b32.xlu1 %v632_v22, %s3928_s25 }
 0x1d6   : > { %686 = vxpose.xlu0.c.b16.start.end [1/1] (short) (narrow) %v675_v24, 16 }
 0x226   : > { %v677_v25 = vpop.permute.xlu1 %676  ;;  %v679_v26 = vpop.permute.xlu0 %678 }
 0x227   : > { %702 = vxpose.xlu1.c.b16.start.end [1/1] (short) (narrow) %v677_v25, 16  ;;  %718 = vxpose.xlu0.c.b16.start.end [1/1] (short) (narrow) %v679_v26, 16 }
 0x22a   : > { %v681_v27 = vpop.permute.xlu1 %680  ;;  %v655_v30 = vpop.permute.xlu0 %654 }
 0x22b   : > { %734 = vxpose.xlu0.c.b16.start.end [1/1] (short) (narrow) %v681_v27, 16 }
 0x22e   : > { %v657_v33 = vpop.permute.xlu1 %656 }
 0x232   : > { %v659_v34 = vpop.permute.xlu1 %658 }
 0x234   : > { %648 = vrot.lane.b32.xlu0 %v646_v29, %s3930_s23 }
 0x238   : > { %v694_v31 = vpop.trf.xlu0 }
 0x239   : > { %v756_v32 = vsel %vm754_vm2, %v694_v31, 0 }
 0x23a   : > { %3332 = vmatpush3.bf16.msra.mxu1 %v756_v32 }
 0x23b   : > { %3337 = vmatprep.subr.bf16.mxu1 %v3923_v1 }
 0x23d   : > { %3334 = vmatmul.mubr.msk.bf16.vlgmr.msra.gmra.mxu1 %vm750_vm3, %v632_v22 }
 0x23e   : > { %3339 = vmatprep.mubr.msk.bf16.mxu1 %vm3924_vm0, %v3923_v1 }
 0x289   : > { %v710_v35 = vpop.trf.xlu1  ;;  %v726_v36 = vpop.trf.xlu0 }
 0x28a   : > { %v802_v37 = vsel %vm754_vm2, %v710_v35, 0  ;;  %v848_v38 = vsel %vm754_vm2, %v726_v36, 0 }
 0x28b   : > { %3338 = vmatpush3.bf16.msra.mxu1 %v802_v37 }
 0x28c   : > { %3343 = vmatprep.subr.bf16.mxu1 %v3923_v1 }
 0x28d   : > { %v742_v39 = vpop.trf.xlu0 }
 0x28e   : > { %3340 = vmatmul.mubr.msk.bf16.vlgmr.msra.gmra.mxu1 %vm750_vm3, %v655_v30  ;;  %v894_v40 = vsel %vm754_vm2, %v742_v39, 0 }
 0x28f   : > { %3344 = vmatpush3.bf16.msra.mxu1 %v848_v38  ;;  %3345 = vmatprep.mubr.msk.bf16.mxu1 %vm3924_vm0, %v3923_v1 }
 0x290   : > { %3349 = vmatprep.subr.bf16.mxu1 %v3923_v1 }
 0x296   : > { %3346 = vmatmul.mubr.msk.bf16.vlgmr.msra.gmra.mxu1 %vm750_vm3, %v657_v33 }
 0x297   : > { %3350 = vmatpush3.bf16.msra.mxu1 %v894_v40  ;;  %3351 = vmatprep.mubr.msk.bf16.mxu1 %vm3924_vm0, %v3923_v1 }
 0x298   : > { %3361 = vmatprep.subr.bf16.mxu1 %v3923_v1 }
 0x29e   : > { %3352 = vmatmul.mubr.msk.bf16.vlgmr.msra.gmra.mxu1 %vm750_vm3, %v659_v34 }
 0x29f   : > { %3363 = vmatprep.mubr.msk.bf16.mxu1 %vm3924_vm0, %v3923_v1 }
 0x2a6   : > { %v649_v47 = vpop.permute.xlu0 %648 }
 0x2a7   : > { %v651_v48 = vadd.f32 %v649_v47, %v4191_v11 }
 0x2a9   : > { %v652_v49 = vpack.c.bf16 %v651_v48, %v651_v48 }
 0x2fd   : > { %v792_v41 = vpop.f32.mrf.mxu1 }
 0x2fe   : > { %v936_v42 = vmul.f32 0.35355338, %v792_v41 }
 0x2ff   : > { %v3335_v43 = vpop.f32.mrf.mxu1 }
 0x300   : > { %v940_v44 = vsel %vm750_vm3, %v936_v42, -inf }
 0x301   : > { %941 = vmax.xlane.f32.xlu1 %v940_v44  ;;  %v795_v45 = vpop.f32.mrf.mxu1 }
 0x303   : > { %v3336_v46 = vpop.f32.mrf.mxu1 }
 0x312   : > { %668 = vrot.lane.b32.xlu1 %v652_v49, %s3927_s17 }
 0x316   : > { %670 = vrot.lane.b32.xlu1 %v652_v49, %s3926_s19 }
 0x34e   : > { %v838_v50 = vpop.f32.mrf.mxu1 }
 0x34f   : > { %v937_v51 = vmul.f32 0.35355338, %v838_v50 }
 0x350   : > { %v3341_v52 = vpop.f32.mrf.mxu1 }
 0x351   : > { %v943_v53 = vsel %vm750_vm3, %v937_v51, -inf }
 0x352   : > { %944 = vmax.xlane.f32.xlu0 %v943_v53  ;;  %v841_v54 = vpop.f32.mrf.mxu1 }
 0x354   : > { %v3342_v55 = vpop.f32.mrf.mxu1 }
 0x356   : > { %v884_v56 = vpop.f32.mrf.mxu1 }
 0x357   : > { %v938_v57 = vmul.f32 0.35355338, %v884_v56 }
 0x358   : > { %v3347_v58 = vpop.f32.mrf.mxu1 }
 0x359   : > { %v946_v59 = vsel %vm750_vm3, %v938_v57, -inf }
 0x35a   : > { %v887_v60 = vpop.f32.mrf.mxu1  ;;  %947 = vmax.xlane.f32.xlu1 %v946_v59 }
 0x35c   : > { %v3348_v61 = vpop.f32.mrf.mxu1 }
 0x35e   : > { %v930_v62 = vpop.f32.mrf.mxu1 }
 0x35f   : > { %v939_v63 = vmul.f32 0.35355338, %v930_v62 }
 0x360   : > { %v3353_v0 = vpop.f32.mrf.mxu1 }
 0x361   : > { %v949_v4 = vsel %vm750_vm3, %v939_v63, -inf }
 0x362   : > { %v933_v5 = vpop.f32.mrf.mxu1  ;;  %950 = vmax.xlane.f32.xlu1 %v949_v4 }
 0x364   : > { %v3354_v8 = vpop.f32.mrf.mxu1 }
 0x368   : > { %672 = vrot.lane.b32.xlu0 %v652_v49, %s3928_s25 }
 0x373   : > { %988 = vrot.lane.b32.xlu1 %v652_v49, %s3930_s23 }
 0x38a   : > { %v942_v9 = vpop.xlane.xlu1 %941 }
 0x38b   : > { %v952_v10 = vsub.f32 %v936_v42, %v942_v9 }
 0x38d   : > { %v956_v11 = vmul.f32 1.442695, %v952_v10 }
 0x38e   : > { %v669_v12 = vpop.permute.xlu1 %668 }
 0x38f   : > { %3639 = vpow2.f32 %v956_v11  ;;  %990 = vrot.lane.b32.xlu0 %v669_v12, %s3930_s23 }
 0x392   : > { %v671_v19 = vpop.permute.xlu1 %670 }
 0x39c   : > { %v3640_v13 = vpop.eup %3639 }
 0x39d   : > { %v964_v14 = vsel %vm750_vm3, %v3640_v13, 0.0 }
 0x39e   : > { %965 = vadd.xlane.f32.xlu1 %v964_v14 }
 0x3db   : > { %v945_v15 = vpop.xlane.xlu0 %944 }
 0x3dc   : > { %v953_v16 = vsub.f32 %v937_v51, %v945_v15 }
 0x3de   : > { %v958_v18 = vmul.f32 1.442695, %v953_v16 }
 0x3df   : > { %v673_v33 = vpop.permute.xlu0 %672 }
 0x3e0   : > { %3641 = vpow2.f32 %v958_v18 }
 0x3e3   : > { %v948_v20 = vpop.xlane.xlu1 %947 }
 0x3e4   : > { %v954_v21 = vsub.f32 %v938_v57, %v948_v20 }
 0x3e6   : > { %v960_v22 = vmul.f32 1.442695, %v954_v21  ;;  %v3931_v21 = vmov 1983009808  }
 0x3e8   : > { %3643 = vpow2.f32 %v960_v22  ;;  %v1379_v22 = vunpack.c.l.s4 %v3931_v21 }
 0x3eb   : > { %v951_v23 = vpop.xlane.xlu1 %950 }
 0x3ec   : > { %v955_v24 = vsub.f32 %v939_v63, %v951_v23  ;;  %v3932_v23 = vmov 1934713408  }
 0x3ed   : > { %v3642_v25 = vpop.eup %3641 }
 0x3ee   : > { %v962_v26 = vmul.f32 1.442695, %v955_v24  ;;  %v967_v27 = vsel %vm750_vm3, %v3642_v25, 0.0  ;;  %v1411_v24 = vunpack.c.l.s4 %v3932_v23 }
 0x3ef   : > { %968 = vadd.xlane.f32.xlu0 %v967_v27  ;;  %v989_v34 = vpop.permute.xlu1 %988 }
 0x3f0   : > { %3645 = vpow2.f32 %v962_v26  ;;  %v1380_v26 = vunpack.c.0.s8 %v1379_v22 }
 0x3f5   : > { %v3644_v29 = vpop.eup %3643 }
 0x3f6   : > { %v970_v30 = vsel %vm750_vm3, %v3644_v29, 0.0 }
 0x3f7   : > { %971 = vadd.xlane.f32.xlu1 %v970_v30  ;;  %v4272_v30 = vsub.s32 %v1380_v26, %v4159_v2 }
 0x3fd   : > { %v3646_v31 = vpop.eup %3645 }
 0x3fe   : > { %v973_v32 = vsel %vm750_vm3, %v3646_v31, 0.0 }
 0x3ff   : > { %974 = vadd.xlane.f32.xlu0 %v973_v32 }
 0x401   : > { %v991_v36 = vpop.permute.xlu0 %990 }
 0x408   : > { %992 = vrot.lane.b32.xlu1 %v671_v19, %s3930_s23 }
 0x415   : > { %994 = vrot.lane.b32.xlu0 %v673_v33, %s3930_s23  ;;  %s532_s23 = sand.u32 1, %s3903_s26  }
 0x427   : > { %v966_v35 = vpop.xlane.xlu1 %965 }
 0x428   : > { %3647 = vrcp.f32 %v966_v35 }
 0x42b   : > { %1000 = vxpose.xlu1.c.b16.start.end [1/1] (short) (narrow) %v989_v34, 16 }
 0x433   : > { %1016 = vxpose.xlu0.c.b16.start.end [1/1] (short) (narrow) %v991_v36, 16 }
 0x435   : > { %v3648_v37 = vpop.eup %3647 }
 0x436   : > { %v977_v38 = vmul.f32 %v3648_v37, %v3640_v13 }
 0x438   : > { %v984_v39 = vpack.c.bf16 %v977_v38, %v977_v38 }
 0x43a   : > { %v1068_v40 = vsel %vm750_vm3, %v984_v39, 0 }
 0x43b   : > { %3356 = vmatpush3.bf16.xpose.msra.mxu0 %v1068_v40 }
 0x43c   : > { %3367 = vmatprep.subr.bf16.mxu0 %v3923_v1 }
 0x478   : > { %v969_v41 = vpop.xlane.xlu0 %968 }
 0x479   : > { %3649 = vrcp.f32 %v969_v41  ;;  %v3619_v41 = vld [vmem:[%s4561_s3 + $0x8] sm:$0xff]  }
 0x480   : > { %v972_v42 = vpop.xlane.xlu1 %971 }
 0x481   : > { %3651 = vrcp.f32 %v972_v42 }
 0x484   : > { %v993_v43 = vpop.permute.xlu1 %992 }
 0x485   : > { %1032 = vxpose.xlu1.c.b16.start.end [1/1] (short) (narrow) %v993_v43, 16 }
 0x486   : > { %v3650_v44 = vpop.eup %3649 }
 0x487   : > { %v979_v45 = vmul.f32 %v3650_v44, %v3642_v25 }
 0x488   : > { %v975_v46 = vpop.xlane.xlu0 %974 }
 0x489   : > { %3653 = vrcp.f32 %v975_v46  ;;  %v985_v47 = vpack.c.bf16 %v979_v45, %v979_v45 }
 0x48b   : > { %v1114_v48 = vsel %vm750_vm3, %v985_v47, 0 }
 0x48c   : > { %3362 = vmatpush3.bf16.xpose.msra.mxu1 %v1114_v48  ;;  %v995_v49 = vpop.permute.xlu0 %994 }
 0x48d   : > { %1048 = vxpose.xlu1.c.b16.start.end [1/1] (short) (narrow) %v995_v49, 16  ;;  %v1008_v50 = vpop.trf.xlu1  ;;  %3373 = vmatprep.subr.bf16.mxu1 %v3923_v1 }
 0x48e   : > { %v3652_v51 = vpop.eup %3651  ;;  %3358 = vmatmul.mubr.msk.bf16.vlgmr.msra.gmra.mxu0 %vm750_vm3, %v1008_v50  ;;  %v3620_v50 = vld [vmem:[%s4561_s3] sm:$0xff]  }
 0x48f   : > { %v981_v52 = vmul.f32 %v3652_v51, %v3644_v29  ;;  %3369 = vmatprep.mubr.msk.bf16.mxu0 %vm3924_vm0, %v3923_v1  ;;  %v1412_v29 = vunpack.c.0.s8 %v1411_v24 }
 0x491   : > { %v986_v53 = vpack.c.bf16 %v981_v52, %v981_v52  ;;  %v4275_v36 = vsub.s32 %v1412_v29, %v4159_v2 }
 0x493   : > { %v1160_v54 = vsel %vm750_vm3, %v986_v53, 0 }
 0x494   : > { %3368 = vmatpush3.bf16.xpose.msra.mxu0 %v1160_v54 }
 0x495   : > { %v1024_v55 = vpop.trf.xlu0  ;;  %3379 = vmatprep.subr.bf16.mxu0 %v3923_v1 }
 0x496   : > { %v3654_v56 = vpop.eup %3653  ;;  %3364 = vmatmul.mubr.msk.bf16.vlgmr.msra.gmra.mxu1 %vm750_vm3, %v1024_v55 }
 0x497   : > { %v983_v57 = vmul.f32 %v3654_v56, %v3646_v31  ;;  %3375 = vmatprep.mubr.msk.bf16.mxu1 %vm3924_vm0, %v3923_v1 }
 0x499   : > { %v987_v58 = vpack.c.bf16 %v983_v57, %v983_v57 }
 0x49b   : > { %v1206_v59 = vsel %vm750_vm3, %v987_v58, 0 }
 0x49c   : > { %3374 = vmatpush3.bf16.xpose.msra.mxu1 %v1206_v59 }
 0x49d   : > { %3387 = vmatprep.subr.bf16.mxu1 %v3923_v1 }
 0x4e7   : > { %v1040_v60 = vpop.trf.xlu1 }
 0x4e8   : > { %3370 = vmatmul.mubr.msk.bf16.vlgmr.msra.gmra.mxu0 %vm750_vm3, %v1040_v60 }
 0x4e9   : > { %3383 = vmatprep.mubr.msk.bf16.mxu0 %vm3924_vm0, %v3923_v1  ;;  %3380 = vmatpush3.bf16.msra.mxu0 %v3619_v41 }
 0x4ea   : > { %3381 = vmatprep.subr.bf16.mxu0 %v3923_v1 }
 0x4ed   : > { %3382 = vmatpush3.bf16.msra.mxu0 %v3620_v50 }
 0x4ee   : > { %3395 = vmatprep.subr.bf16.mxu0 %v3923_v1 }
 0x4ef   : > { %v1056_v61 = vpop.trf.xlu1 }
 0x4f0   : > { %3376 = vmatmul.mubr.msk.bf16.vlgmr.msra.gmra.mxu1 %vm750_vm3, %v1056_v61 }
 0x4f1   : > { %3391 = vmatprep.mubr.msk.bf16.mxu1 %vm3924_vm0, %v3923_v1 }
 0x54e   : > { %v1104_v62 = vpop.f32.mrf.mxu0 }
 0x54f   : > { %1248 = vxpose.xlu1.b32.start.end [1/1] (short) (narrow) %v1104_v62, 8 }
 0x550   : > { %v3359_v63 = vpop.f32.mrf.mxu0 }
 0x552   : > { %v1107_v0 = vpop.f32.mrf.mxu0 }
 0x554   : > { %v3360_v4 = vpop.f32.mrf.mxu0 }
 0x556   : > { %v1150_v5 = vpop.f32.mrf.mxu1 }
 0x557   : > { %1280 = vxpose.xlu0.b32.start.end [1/1] (short) (narrow) %v1150_v5, 8 }
 0x558   : > { %v3365_v8 = vpop.f32.mrf.mxu1 }
 0x55a   : > { %v1153_v9 = vpop.f32.mrf.mxu1 }
 0x55c   : > { %v3366_v10 = vpop.f32.mrf.mxu1 }
 0x5a8   : > { %v1196_v11 = vpop.f32.mrf.mxu0 }
 0x5a9   : > { %1312 = vxpose.xlu0.b32.start.end [1/1] (short) (narrow) %v1196_v11, 8 }
 0x5aa   : > { %v3371_v12 = vpop.f32.mrf.mxu0 }
 0x5ac   : > { %v1199_v13 = vpop.f32.mrf.mxu0 }
 0x5ae   : > { %v3372_v14 = vpop.f32.mrf.mxu0 }
 0x5b0   : > { %v1242_v15 = vpop.f32.mrf.mxu1 }
 0x5b1   : > { %1344 = vxpose.xlu1.b32.start.end [1/1] (short) (narrow) %v1242_v15, 8 }
 0x5b2   : > { %v3377_v16 = vpop.f32.mrf.mxu1 }
 0x5b4   : > { %v1245_v18 = vpop.f32.mrf.mxu1 }
 0x5b6   : > { %v3378_v19 = vpop.f32.mrf.mxu1 }
 0x5cb   : > { %v1264_v25 = vpop.trf.xlu1 }
 0x5d3   : > { %v1296_v20 = vpop.trf.xlu0 }
 0x625   : > { %v1328_v27 = vpop.trf.xlu0 }
 0x626   : > { %v1376_v31 = vcombine.low %v1264_v25, %v1328_v27  ;;  %v1377_v32 = vcombine.high %v1264_v25, %v1328_v27 }
 0x628   : > { %v1384_v37 = vrot.slane %v1376_v31, %v4272_v30  ;;  %v1391_v38 = vrot.slane %v1377_v32, %v4272_v30 }
 0x62d   : > { %v1360_v33 = vpop.trf.xlu1 }
 0x62e   : > { %v1392_v34 = vcombine.low %v1296_v20, %v1360_v33  ;;  %v1393_v35 = vcombine.high %v1296_v20, %v1360_v33  ;;  %v1532_v20 = vsub.s32 3, %v4159_v2 }
 0x630   : > { %v1400_v39 = vrot.slane %v1392_v34, %v4272_v30  ;;  %v1407_v40 = vrot.slane %v1393_v35, %v4272_v30  ;;  %v1533_v21 = vrot.slane %v4179_v7, %v1532_v20 }
 0x632   : > { %v1408_v42 = vcombine.low %v1384_v37, %v1400_v39  ;;  %v1409_v43 = vcombine.high %v1384_v37, %v1400_v39  ;;  %v1424_v44 = vcombine.low %v1391_v38, %v1407_v40  ;;  %v1425_v45 = vcombine.high %v1391_v38, %v1407_v40  ;;  %v3621_v37 = vld [vmem:[#allocation2 + $0x8] sm:$0xff]   ;;  %v3622_v38 = vld [vmem:[#allocation2] sm:$0xff]   ;;  %v3624_v39 = vld [vmem:[%s4563_s5 + $0x10] sm:$0xff]  }
 0x633   : > { %3388 = vmatpush3.bf16.msra.mxu1 %v3621_v37  ;;  %v546_v37 = vld [vmem:[%s543_s15] sm:$0xff] }
 0x634   : > { %v1416_v46 = vrot.slane %v1408_v42, %v4275_v36  ;;  %v1423_v47 = vrot.slane %v1409_v43, %v4275_v36  ;;  %v1432_v48 = vrot.slane %v1424_v44, %v4275_v36  ;;  %v1439_v49 = vrot.slane %v1425_v45, %v4275_v36  ;;  %3389 = vmatprep.subr.bf16.mxu1 %v3923_v1 }
 0x635   : > { %v1606_v43 = vsub.s32 6, %v4159_v2  ;;  %v1611_v44 = vsub.s32 7, %v4159_v2 }
 0x636   : > { %v1444_v51 = vcombine.low %v1416_v46, %v1423_v47  ;;  %v3215_v52 = vcombine.high %v1416_v46, %v1423_v47  ;;  %v1460_v53 = vcombine.low %v1432_v48, %v1439_v49  ;;  %v3216_v54 = vcombine.high %v1432_v48, %v1439_v49 }
 0x637   : > { %3390 = vmatpush3.bf16.msra.mxu1 %v3622_v38  ;;  %v1607_v45 = vrot.slane %v4179_v7, %v1606_v43  ;;  %v1612_v48 = vrot.slane %v4179_v7, %v1611_v44  ;;  %v547_v38 = vld [vmem:[%s543_s15 + $0x8] sm:$0xff]  ;;  %s3200_s15 = sshll.u32 %s532_s23, 3 }
 0x638   : > { %v1451_v55 = vrot.slane %v1444_v51, %v4272_v30  ;;  %v1459_v56 = vrot.slane %v3215_v52, %v4272_v30  ;;  %v1467_v57 = vrot.slane %v1460_v53, %v4272_v30  ;;  %v1475_v58 = vrot.slane %v3216_v54, %v4272_v30  ;;  %3407 = vmatprep.subr.bf16.mxu1 %v3923_v1  ;;  %v3625_v52 = vld [vmem:[%s4563_s5 + $0x8] sm:$0xff]   ;;  %v3626_v53 = vld [vmem:[%s4563_s5] sm:$0xff]  }
 0x639   : > { %v1617_v54 = vsub.s32 4, %v4159_v2 }
 0x63a   : > { %v1477_v59 = vcombine.high %v1451_v55, %v1459_v56  ;;  %v1493_v60 = vcombine.high %v1467_v57, %v1475_v58  ;;  %v1476_v61 = vcombine.low %v1451_v55, %v1459_v56  ;;  %v1492_v62 = vcombine.low %v1467_v57, %v1475_v58 }
 0x63b   : > { %v1618_v55 = vrot.slane %v4179_v7, %v1617_v54 }
 0x63c   : > { %v1491_v63 = vrot.slane %v1477_v59, %v4275_v36  ;;  %v1507_v0 = vrot.slane %v1493_v60, %v4275_v36  ;;  %v1484_v4 = vrot.slane %v1476_v61, %v4275_v36  ;;  %v1500_v5 = vrot.slane %v1492_v62, %v4275_v36 }
 0x63e   : > { %v1510_v8 = vcombine.low %v1491_v63, %v1507_v0  ;;  %v1509_v9 = vcombine.high %v1484_v4, %v1500_v5  ;;  %v1508_v10 = vcombine.low %v1484_v4, %v1500_v5  ;;  %v1511_v11 = vcombine.high %v1491_v63, %v1507_v0 }
 0x63f   : > { %v1678_v63 = vsub.s32 5, %v4159_v2 }
 0x640   : > { %1517 = vrot.lane.b32.xlu1 %v1510_v8, %s3933_s22  ;;  %1513 = vrot.lane.b32.xlu0 %v1509_v9, %s3934_s30 }
 0x641   : > { %v1679_v0 = vrot.slane %v4179_v7, %v1678_v63  ;;  %v3628_v7 = vld [vmem:[#allocation7] sm:$0xff]  }
 0x644   : > { %1521 = vrot.lane.b32.xlu1 %v1511_v11, %s3935_s27 }
 0x6b2   : > { %v1518_v12 = vpop.permute.xlu1 %1517  ;;  %v1514_v13 = vpop.permute.xlu0 %1513 }
 0x6b3   : > { %v1524_v14 = vsel %vm750_vm3, %v1508_v10, %v1514_v13 }
 0x6b4   : > { %v1526_v16 = vsel %vm1525_vm4, %v1524_v14, %v1518_v12 }
 0x6b6   : > { %v1522_v15 = vpop.permute.xlu1 %1521 }
 0x6b7   : > { %v1528_v18 = vsel %vm1527_vm5, %v1526_v16, %v1522_v15 }
 0x6b8   : > { %v1529_v19 = vpack.c.bf16 %v1528_v18, %v1528_v18 }
 0x6ba   : > { %3384 = vmatmul.mubr.msk.bf16.vlgmr.msra.gmra.mxu0 %vm583_vm1, %v1529_v19  ;;  %v3627_v19 = vld [vmem:[#allocation7 + $0x8] sm:$0xff]  }
 0x6bb   : > { %3403 = vmatprep.mubr.msk.bf16.mxu0 %vm3924_vm0, %v3923_v1 }
 0x77a   : > { %v1583_v22 = vpop.f32.mrf.mxu0 }
 0x77b   : > { %v1584_v23 = vadd.f32 %v1583_v22, %v1533_v21 }
 0x77c   : > { %v3385_v24 = vpop.f32.mrf.mxu0 }
 0x77d   : > { %v1589_v25 = vadd.f32 %v1584_v23, %v4177_v6  ;;  %v3623_v6 = vld [vmem:[%s4563_s5 + $0x18] sm:$0xff]  }
 0x77e   : > { %v1586_v26 = vpop.f32.mrf.mxu0  ;;  %3396 = vmatpush3.bf16.msra.mxu0 %v3623_v6  ;;  %v569_v24 = vld [vmem:[#allocation5 + $0x8] sm:$0x3]  ;;  %v1859_v6 = vpack.c.bf16 %v547_v38, %v546_v37 }
 0x77f   : > { %v1590_v27 = vsel %vm583_vm1, %v1589_v25, 0.0  ;;  %3397 = vmatprep.subr.bf16.mxu0 %v3923_v1 }
 0x780   : > { %1591 = vadd.xlane.f32.xlu1 %v1590_v27  ;;  %v3386_v29 = vpop.f32.mrf.mxu0 }
 0x781   : > { %v1770_v29 = vrot.slane %v569_v24, %v4169_v3 }
 0x782   : > { %3398 = vmatpush3.bf16.msra.mxu0 %v3624_v39 }
 0x783   : > { %3399 = vmatprep.subr.bf16.mxu0 %v3923_v1 }
 0x786   : > { %3400 = vmatpush3.bf16.msra.mxu0 %v3625_v52 }
 0x787   : > { %3401 = vmatprep.subr.bf16.mxu0 %v3923_v1 }
 0x78a   : > { %3402 = vmatpush3.bf16.msra.mxu0 %v3626_v53 }
 0x78b   : > { %3423 = vmatprep.subr.bf16.mxu0 %v3923_v1 }
 0x809   : > { %v1592_v31 = vpop.xlane.xlu1 %1591 }
 0x80a   : > { %v1594_v32 = vmul.f32 0.03125, %v1592_v31 }
 0x80c   : > { %v1595_v33 = vsub.f32 %v1589_v25, %v1594_v32  ;;  %v1765_v25 = vrot.slane %v569_v24, %v4199_v17 }
 0x80e   : > { %v1596_v34 = vmul.f32 %v1595_v33, %v1595_v33 }
 0x810   : > { %v1597_v35 = vsel %vm583_vm1, %v1596_v34, 0.0 }
 0x811   : > { %1598 = vadd.xlane.f32.xlu0 %v1597_v35  ;;  %v3630_v35 = vld [vmem:[#allocation8] sm:$0xff]  }
 0x89a   : > { %v1599_v40 = vpop.xlane.xlu0 %1598 }
 0x89b   : > { %v1600_v41 = vmul.f32 0.03125, %v1599_v40 }
 0x89d   : > { %v1601_v42 = vadd.f32 1e-05, %v1600_v41 }
 0x89f   : > { %3655 = vrsqrt.f32 %v1601_v42 }
 0x8ac   : > { %v3656_v46 = vpop.eup %3655 }
 0x8ad   : > { %v1603_v47 = vmul.f32 %v3656_v46, %v1595_v33  ;;  %v3629_v33 = vld [vmem:[#allocation8 + $0x8] sm:$0xff]  }
 0x8af   : > { %v1608_v49 = vmul.f32 %v1607_v45, %v1603_v47  ;;  %v4379_v45 = vld [vmem:[#allocation11] sm:$0xff] }
 0x8b0   : > { %v1919_v47 = vrot.slane %v4379_v45, %v4169_v3 }
 0x8b1   : > { %v1613_v50 = vadd.f32 %v1612_v48, %v1608_v49  ;;  %v1802_v49 = vrot.slane %v4379_v45, %v4199_v17 }
 0x8b3   : > { %v1614_v51 = vpack.c.bf16 %v1613_v50, %v1613_v50 }
 0x8b5   : > { %3392 = vmatmul.mubr.msk.bf16.vlgmr.msra.gmra.mxu1 %vm583_vm1, %v1614_v51 }
 0x8b6   : > { %3411 = vmatprep.mubr.msk.bf16.mxu1 %vm3924_vm0, %v3923_v1  ;;  %3408 = vmatpush3.bf16.msra.mxu1 %v3627_v19 }
 0x8b7   : > { %3409 = vmatprep.subr.bf16.mxu1 %v3923_v1 }
 0x8ba   : > { %3410 = vmatpush3.bf16.msra.mxu1 %v3628_v7 }
 0x8bb   : > { %3415 = vmatprep.subr.bf16.mxu1 %v3923_v1 }
 0x975   : > { %v1668_v56 = vpop.f32.mrf.mxu1 }
 0x976   : > { %v1669_v57 = vadd.f32 %v1668_v56, %v1618_v55 }
 0x977   : > { %v3393_v58 = vpop.f32.mrf.mxu1 }
 0x978   : > { %v1674_v59 = vmax.f32 %v1669_v57, 0.0 }
 0x979   : > { %v1671_v60 = vpop.f32.mrf.mxu1 }
 0x97a   : > { %v1675_v61 = vpack.c.bf16 %v1674_v59, %v1674_v59  ;;  %v1926_v60 = vrot.slane %v4379_v45, %v645_v28 }
 0x97b   : > { %v3394_v62 = vpop.f32.mrf.mxu1 }
 0x97c   : > { %3404 = vmatmul.mubr.msk.bf16.vlgmr.msra.gmra.mxu0 %vm1704_vm6, %v1675_v61 }
 0x97d   : > { %3425 = vmatprep.mubr.msk.bf16.mxu0 %vm3924_vm0, %v3923_v1 }
 0xa3c   : > { %v1742_v4 = vpop.f32.mrf.mxu0 }
 0xa3d   : > { %v1743_v5 = vadd.f32 %v1742_v4, %v1679_v0 }
 0xa3e   : > { %v3405_v8 = vpop.f32.mrf.mxu0 }
 0xa3f   : > { %v1748_v9 = vadd.f32 %v1743_v5, %v1613_v50 }
 0xa40   : > { %v1745_v10 = vpop.f32.mrf.mxu0 }
 0xa41   : > { %v1749_v11 = vsel %vm583_vm1, %v1748_v9, 0.0 }
 0xa42   : > { %1750 = vadd.xlane.f32.xlu1 %v1749_v11  ;;  %v3406_v12 = vpop.f32.mrf.mxu0 }
 0xacb   : > { %v1751_v13 = vpop.xlane.xlu1 %1750 }
 0xacc   : > { %v1752_v14 = vmul.f32 0.03125, %v1751_v13 }
 0xace   : > { %v1753_v15 = vsub.f32 %v1748_v9, %v1752_v14 }
 0xad0   : > { %v1754_v16 = vmul.f32 %v1753_v15, %v1753_v15 }
 0xad2   : > { %v1755_v18 = vsel %vm583_vm1, %v1754_v16, 0.0 }
 0xad3   : > { %1756 = vadd.xlane.f32.xlu0 %v1755_v18 }
 0xb5c   : > { %v1757_v21 = vpop.xlane.xlu0 %1756 }
 0xb5d   : > { %v1758_v22 = vmul.f32 0.03125, %v1757_v21 }
 0xb5f   : > { %v1759_v23 = vadd.f32 1e-05, %v1758_v22 }
 0xb61   : > { %3657 = vrsqrt.f32 %v1759_v23 }
 0xb6e   : > { %v3658_v26 = vpop.eup %3657 }
 0xb6f   : > { %v1761_v27 = vmul.f32 %v3658_v26, %v1753_v15 }
 0xb71   : > { %v1766_v31 = vmul.f32 %v1765_v25, %v1761_v27 }
 0xb73   : > { %v4364_v32 = vadd.f32 %v1770_v29, %v1766_v31 }
 0xb75   : > { %v1798_v34 = vpack.c.bf16 %v4364_v32, %v4364_v32 }
 0xb77   : > { %3412 = vmatmul.mubr.msk.bf16.vlgmr.msra.gmra.mxu1 %vm583_vm1, %v1798_v34 }
 0xb78   : > { %3416 = vmatpush3.bf16.msra.mxu1 %v3629_v33  ;;  %3419 = vmatprep.mubr.msk.bf16.mxu1 %vm3924_vm0, %v3923_v1 }
 0xb79   : > { %3417 = vmatprep.subr.bf16.mxu1 %v3923_v1 }
 0xb7c   : > { %3418 = vmatpush3.bf16.msra.mxu1 %v3630_v35 }
 0xb7d   : > { %3429 = vmatprep.subr.bf16.mxu1 %v3923_v1 }
 0xb7f   : > { %3420 = vmatmul.mubr.msk.bf16.vlgmr.msra.gmra.mxu1 %vm583_vm1, %v1859_v6 }
 0xb80   : > { %3431 = vmatprep.mubr.msk.bf16.mxu1 %vm3924_vm0, %v3923_v1 }
 0xc37   : > { %v1852_v39 = vpop.f32.mrf.mxu1 }
 0xc38   : > { %v1853_v55 = vadd.f32 %v1852_v39, %v1802_v49 }
 0xc39   : > { %v3413_v40 = vpop.f32.mrf.mxu1 }
 0xc3a   : > { %v1858_v57 = vpack.c.bf16 %v1853_v55, %v1853_v55 }
 0xc3b   : > { %v1855_v41 = vpop.f32.mrf.mxu1 }
 0xc3d   : > { %v3414_v42 = vpop.f32.mrf.mxu1 }
 0xc3f   : > { %v1909_v46 = vpop.f32.mrf.mxu1 }
 0xc40   : > { %v1920_v51 = vadd.f32 %v1919_v47, %v1909_v46 }
 0xc41   : > { %v3421_v48 = vpop.f32.mrf.mxu1 }
 0xc43   : > { %v1912_v50 = vpop.f32.mrf.mxu1 }
 0xc44   : > { %v1921_v52 = vadd.f32 %v1919_v47, %v1912_v50 }
 0xc45   : > { %v3422_v53 = vpop.f32.mrf.mxu1 }
 0xc46   : > { %v1922_v56 = vpack.c.bf16 %v1921_v52, %v1920_v51 }
 0xc48   : > { %1945 = vrot.lane.b32.xlu0 %v1922_v56, %s3926_s19  ;;  %1942 = vrot.lane.b32.xlu1 %v1922_v56, %s3927_s17 }
 0xc4c   : > { %1937 = vrot.lane.b32.xlu0 %v1858_v57, %s3926_s19  ;;  %1948 = vrot.lane.b32.xlu1 %v1922_v56, %s3928_s25 }
 0xc50   : > { %1935 = vrot.lane.b32.xlu1 %v1858_v57, %s3927_s17 }
 0xc54   : > { %1939 = vrot.lane.b32.xlu1 %v1858_v57, %s3928_s25 }
 0xc6a   : > { %1958 = vxpose.xlu0.c.b16.start.end [1/1] (short) (narrow) %v1922_v56, 16 }
 0xcba   : > { %v1946_v58 = vpop.permute.xlu0 %1945  ;;  %v1943_v59 = vpop.permute.xlu1 %1942 }
 0xcbb   : > { %1990 = vxpose.xlu0.c.b16.start.end [1/1] (short) (narrow) %v1946_v58, 16  ;;  %1974 = vxpose.xlu1.c.b16.start.end [1/1] (short) (narrow) %v1943_v59, 16 }
 0xcbe   : > { %v1949_v61 = vpop.permute.xlu1 %1948  ;;  %v1938_v62 = vpop.permute.xlu0 %1937 }
 0xcbf   : > { %1928 = vrot.lane.b32.xlu1 %v1926_v60, %s3925_s14  ;;  %2006 = vxpose.xlu0.c.b16.start.end [1/1] (short) (narrow) %v1949_v61, 16  ;;  %s534_s14 = scalar_lea.vmem [#allocation13], %s3200_s15 }
 0xcc2   : > { %v1936_v5 = vpop.permute.xlu1 %1935 }
 0xcc6   : > { %v1940_v8 = vpop.permute.xlu1 %1939 }
 0xccc   : > { %v1966_v0 = vpop.trf.xlu0 }
 0xccd   : > { %v2026_v4 = vsel %vm754_vm2, %v1966_v0, 0 }
 0xcce   : > { %3424 = vmatpush3.bf16.msra.mxu0 %v2026_v4 }
 0xccf   : > { %3435 = vmatprep.subr.bf16.mxu0 %v3923_v1 }
 0xcd1   : > { %3426 = vmatmul.mubr.msk.bf16.vlgmr.msra.gmra.mxu0 %vm750_vm3, %v1858_v57 }
 0xcd2   : > { %3437 = vmatprep.mubr.msk.bf16.mxu0 %vm3924_vm0, %v3923_v1 }
 0xd1d   : > { %v1998_v9 = vpop.trf.xlu0  ;;  %v1982_v28 = vpop.trf.xlu1 }
 0xd1e   : > { %v2118_v10 = vsel %vm754_vm2, %v1998_v9, 0  ;;  %v2072_v11 = vsel %vm754_vm2, %v1982_v28, 0 }
 0xd1f   : > { %3430 = vmatpush3.bf16.msra.mxu1 %v2072_v11  ;;  %3436 = vmatpush3.bf16.msra.mxu0 %v2118_v10 }
 0xd20   : > { %3441 = vmatprep.subr.bf16.mxu1 %v3923_v1  ;;  %3447 = vmatprep.subr.bf16.mxu0 %v3923_v1 }
 0xd21   : > { %v2014_v12 = vpop.trf.xlu0 }
 0xd22   : > { %3432 = vmatmul.mubr.msk.bf16.vlgmr.msra.gmra.mxu1 %vm750_vm3, %v1936_v5  ;;  %3438 = vmatmul.mubr.msk.bf16.vlgmr.msra.gmra.mxu0 %vm750_vm3, %v1938_v62  ;;  %v2164_v13 = vsel %vm754_vm2, %v2014_v12, 0 }
 0xd23   : > { %3442 = vmatpush3.bf16.msra.mxu1 %v2164_v13  ;;  %3443 = vmatprep.mubr.msk.bf16.mxu1 %vm3924_vm0, %v3923_v1 }
 0xd24   : > { %3449 = vmatprep.mubr.msk.bf16.mxu0 %vm3924_vm0, %v3923_v1  ;;  %3453 = vmatprep.subr.bf16.mxu1 %v3923_v1 }
 0xd2a   : > { %3444 = vmatmul.mubr.msk.bf16.vlgmr.msra.gmra.mxu1 %vm750_vm3, %v1940_v8 }
 0xd2b   : > { %3455 = vmatprep.mubr.msk.bf16.mxu1 %vm3924_vm0, %v3923_v1 }
 0xd31   : > { %v1929_v21 = vpop.permute.xlu1 %1928 }
 0xd32   : > { %v1931_v22 = vadd.f32 %v1929_v21, %v1909_v46  ;;  %v1932_v23 = vadd.f32 %v1929_v21, %v1912_v50 }
 0xd34   : > { %v1933_v24 = vpack.c.bf16 %v1932_v23, %v1931_v22 }
 0xd91   : > { %v2062_v14 = vpop.f32.mrf.mxu0 }
 0xd92   : > { %v2206_v15 = vmul.f32 0.35355338, %v2062_v14 }
 0xd93   : > { %v3427_v16 = vpop.f32.mrf.mxu0 }
 0xd94   : > { %v2210_v18 = vsel %vm1525_vm4, %v2206_v15, -inf }
 0xd95   : > { %2211 = vmax.xlane.f32.xlu0 %v2210_v18  ;;  %v2065_v19 = vpop.f32.mrf.mxu0 }
 0xd97   : > { %v3428_v7 = vpop.f32.mrf.mxu0 }
 0xdab   : > { %1952 = vrot.lane.b32.xlu0 %v1933_v24, %s3927_s17 }
 0xde2   : > { %v2108_v25 = vpop.f32.mrf.mxu1  ;;  %v2154_v26 = vpop.f32.mrf.mxu0 }
 0xde3   : > { %v2207_v27 = vmul.f32 0.35355338, %v2108_v25  ;;  %v2208_v29 = vmul.f32 0.35355338, %v2154_v26 }
 0xde4   : > { %v3433_v31 = vpop.f32.mrf.mxu1  ;;  %v3439_v33 = vpop.f32.mrf.mxu0 }
 0xde5   : > { %v2213_v34 = vsel %vm1525_vm4, %v2207_v27, -inf  ;;  %v2216_v35 = vsel %vm1525_vm4, %v2208_v29, -inf }
 0xde6   : > { %2214 = vmax.xlane.f32.xlu1 %v2213_v34  ;;  %v2111_v37 = vpop.f32.mrf.mxu1  ;;  %2217 = vmax.xlane.f32.xlu0 %v2216_v35  ;;  %v2157_v38 = vpop.f32.mrf.mxu0 }
 0xde8   : > { %v3434_v6 = vpop.f32.mrf.mxu1  ;;  %v3440_v39 = vpop.f32.mrf.mxu0 }
 0xdea   : > { %v2200_v40 = vpop.f32.mrf.mxu1 }
 0xdeb   : > { %v2209_v41 = vmul.f32 0.35355338, %v2200_v40 }
 0xdec   : > { %v3445_v42 = vpop.f32.mrf.mxu1 }
 0xded   : > { %v2219_v46 = vsel %vm1525_vm4, %v2209_v41, -inf }
 0xdee   : > { %v2203_v47 = vpop.f32.mrf.mxu1  ;;  %2220 = vmax.xlane.f32.xlu0 %v2219_v46 }
 0xdf0   : > { %v3446_v48 = vpop.f32.mrf.mxu1 }
 0xdf7   : > { %1954 = vrot.lane.b32.xlu1 %v1933_v24, %s3926_s19  ;;  %s3053_s19 = sshll.u32 %s534_s14, 4  ;;  %s3054_s19 = int_to_ptr.vmem [resolvable:$true] %s3053_s19 }
 0xe04   : > { %1956 = vrot.lane.b32.xlu0 %v1933_v24, %s3928_s25 }
 0xe08   : > { %2258 = vrot.lane.b32.xlu0 %v1933_v24, %s3929_s28 }
 0xe1e   : > { %v2212_v49 = vpop.xlane.xlu0 %2211 }
 0xe1f   : > { %v2222_v50 = vsub.f32 %v2206_v15, %v2212_v49 }
 0xe21   : > { %v2226_v51 = vmul.f32 1.442695, %v2222_v50 }
 0xe22   : > { %v1953_v52 = vpop.permute.xlu0 %1952 }
 0xe23   : > { %3659 = vpow2.f32 %v2226_v51  ;;  %2260 = vrot.lane.b32.xlu1 %v1953_v52, %s3929_s28 }
 0xe30   : > { %v3660_v53 = vpop.eup %3659 }
 0xe31   : > { %v2234_v55 = vsel %vm1525_vm4, %v3660_v53, 0.0 }
 0xe32   : > { %2235 = vadd.xlane.f32.xlu0 %v2234_v55 }
 0xe6f   : > { %v2215_v56 = vpop.xlane.xlu1 %2214  ;;  %v2218_v57 = vpop.xlane.xlu0 %2217 }
 0xe70   : > { %v2223_v58 = vsub.f32 %v2207_v27, %v2215_v56  ;;  %v2224_v59 = vsub.f32 %v2208_v29, %v2218_v57 }
 0xe72   : > { %v2228_v60 = vmul.f32 1.442695, %v2223_v58  ;;  %v2230_v61 = vmul.f32 1.442695, %v2224_v59 }
 0xe73   : > { %v1955_v12 = vpop.permute.xlu1 %1954 }
 0xe74   : > { %3661 = vpow2.f32 %v2228_v60 }
 0xe75   : > { %3663 = vpow2.f32 %v2230_v61 }
 0xe77   : > { %v2221_v62 = vpop.xlane.xlu0 %2220 }
 0xe78   : > { %v2225_v0 = vsub.f32 %v2209_v41, %v2221_v62 }
 0xe7a   : > { %v2232_v4 = vmul.f32 1.442695, %v2225_v0 }
 0xe7b   : > { %v1957_v13 = vpop.permute.xlu0 %1956 }
 0xe7c   : > { %3665 = vpow2.f32 %v2232_v4 }
 0xe7f   : > { %v2259_v14 = vpop.permute.xlu0 %2258 }
 0xe81   : > { %v3662_v5 = vpop.eup %3661 }
 0xe82   : > { %v3664_v8 = vpop.eup %3663  ;;  %v2237_v9 = vsel %vm1525_vm4, %v3662_v5, 0.0 }
 0xe83   : > { %2238 = vadd.xlane.f32.xlu1 %v2237_v9  ;;  %v2240_v28 = vsel %vm1525_vm4, %v3664_v8, 0.0 }
 0xe84   : > { %2241 = vadd.xlane.f32.xlu0 %v2240_v28 }
 0xe89   : > { %v3666_v10 = vpop.eup %3665 }
 0xe8a   : > { %v2243_v11 = vsel %vm1525_vm4, %v3666_v10, 0.0 }
 0xe8b   : > { %2244 = vadd.xlane.f32.xlu1 %v2243_v11 }
 0xe95   : > { %v2261_v16 = vpop.permute.xlu1 %2260 }
 0xe9a   : > { %2262 = vrot.lane.b32.xlu0 %v1955_v12, %s3929_s28 }
 0xe9c   : > { %2264 = vrot.lane.b32.xlu1 %v1957_v13, %s3929_s28  ;;  %s3051_s28 = scalar_lea.hbm %s4571_s13, %s3256_s20 }
 0xeb8   : > { %2270 = vxpose.xlu0.c.b16.start.end [1/1] (short) (narrow) %v2259_v14, 16 }
 0xebb   : > { %v2236_v15 = vpop.xlane.xlu0 %2235 }
 0xebc   : > { %3667 = vrcp.f32 %v2236_v15 }
 0xebf   : > { %2286 = vxpose.xlu1.c.b16.start.end [1/1] (short) (narrow) %v2261_v16, 16 }
 0xec9   : > { %v3668_v18 = vpop.eup %3667 }
 0xeca   : > { %v2247_v19 = vmul.f32 %v3668_v18, %v3660_v53 }
 0xecc   : > { %v2254_v7 = vpack.c.bf16 %v2247_v19, %v2247_v19 }
 0xece   : > { %v2338_v21 = vsel %vm1525_vm4, %v2254_v7, 0 }
 0xecf   : > { %3448 = vmatpush3.bf16.xpose.msra.mxu0 %v2338_v21 }
 0xed0   : > { %3459 = vmatprep.subr.bf16.mxu0 %v3923_v1 }
 0xf0c   : > { %v2239_v22 = vpop.xlane.xlu1 %2238 }
 0xf0d   : > { %3669 = vrcp.f32 %v2239_v22  ;;  %v2242_v23 = vpop.xlane.xlu0 %2241 }
 0xf0e   : > { %3671 = vrcp.f32 %v2242_v23 }
 0xf11   : > { %v2263_v24 = vpop.permute.xlu0 %2262 }
 0xf12   : > { %2302 = vxpose.xlu0.c.b16.start.end [1/1] (short) (narrow) %v2263_v24, 16  ;;  %v3631_v24 = vld [vmem:[%s4567_s9 + $0x8] sm:$0xff]  }
 0xf14   : > { %v2245_v25 = vpop.xlane.xlu1 %2244 }
 0xf15   : > { %3673 = vrcp.f32 %v2245_v25 }
 0xf18   : > { %v2265_v26 = vpop.permute.xlu1 %2264 }
 0xf19   : > { %2318 = vxpose.xlu0.c.b16.start.end [1/1] (short) (narrow) %v2265_v26, 16 }
 0xf1a   : > { %v3670_v27 = vpop.eup %3669  ;;  %v2278_v29 = vpop.trf.xlu0 }
 0xf1b   : > { %v3672_v31 = vpop.eup %3671  ;;  %3450 = vmatmul.mubr.msk.bf16.vlgmr.msra.gmra.mxu0 %vm1525_vm4, %v2278_v29  ;;  %v2249_v33 = vmul.f32 %v3670_v27, %v3662_v5 }
 0xf1c   : > { %v2251_v34 = vmul.f32 %v3672_v31, %v3664_v8  ;;  %3461 = vmatprep.mubr.msk.bf16.mxu0 %vm3924_vm0, %v3923_v1 }
 0xf1d   : > { %v2255_v35 = vpack.c.bf16 %v2249_v33, %v2249_v33 }
 0xf1e   : > { %v2256_v37 = vpack.c.bf16 %v2251_v34, %v2251_v34 }
 0xf1f   : > { %v2384_v38 = vsel %vm1525_vm4, %v2255_v35, 0 }
 0xf20   : > { %3454 = vmatpush3.bf16.xpose.msra.mxu1 %v2384_v38  ;;  %v2430_v6 = vsel %vm1525_vm4, %v2256_v37, 0  ;;  %v3632_v37 = vld [vmem:[%s4567_s9] sm:$0xff]  }
 0xf21   : > { %3460 = vmatpush3.bf16.xpose.msra.mxu0 %v2430_v6  ;;  %3465 = vmatprep.subr.bf16.mxu1 %v3923_v1  ;;  %v2294_v41 = vpop.trf.xlu1 }
 0xf22   : > { %v3674_v39 = vpop.eup %3673  ;;  %3471 = vmatprep.subr.bf16.mxu0 %v3923_v1 }
 0xf23   : > { %v2253_v40 = vmul.f32 %v3674_v39, %v3666_v10 }
 0xf25   : > { %v2257_v42 = vpack.c.bf16 %v2253_v40, %v2253_v40 }
 0xf27   : > { %3456 = vmatmul.mubr.msk.bf16.vlgmr.msra.gmra.mxu1 %vm1525_vm4, %v2294_v41  ;;  %v2476_v46 = vsel %vm1525_vm4, %v2257_v42, 0 }
 0xf28   : > { %3466 = vmatpush3.bf16.xpose.msra.mxu1 %v2476_v46  ;;  %3467 = vmatprep.mubr.msk.bf16.mxu1 %vm3924_vm0, %v3923_v1 }
 0xf29   : > { %3479 = vmatprep.subr.bf16.mxu1 %v3923_v1 }
 0xf74   : > { %v2310_v47 = vpop.trf.xlu0 }
 0xf75   : > { %3462 = vmatmul.mubr.msk.bf16.vlgmr.msra.gmra.mxu0 %vm1525_vm4, %v2310_v47 }
 0xf76   : > { %3475 = vmatprep.mubr.msk.bf16.mxu0 %vm3924_vm0, %v3923_v1  ;;  %3472 = vmatpush3.bf16.msra.mxu0 %v3631_v24 }
 0xf77   : > { %3473 = vmatprep.subr.bf16.mxu0 %v3923_v1 }
 0xf7a   : > { %3474 = vmatpush3.bf16.msra.mxu0 %v3632_v37 }
 0xf7b   : > { %v2326_v48 = vpop.trf.xlu0  ;;  %3487 = vmatprep.subr.bf16.mxu0 %v3923_v1 }
 0xf7c   : > { %3468 = vmatmul.mubr.msk.bf16.vlgmr.msra.gmra.mxu1 %vm1525_vm4, %v2326_v48 }
 0xf7d   : > { %3483 = vmatprep.mubr.msk.bf16.mxu1 %vm3924_vm0, %v3923_v1 }
 0xfdb   : > { %v2374_v49 = vpop.f32.mrf.mxu0 }
 0xfdc   : > { %2518 = vxpose.xlu0.b32.start.end [1/1] (short) (narrow) %v2374_v49, 8 }
 0xfdd   : > { %v3451_v50 = vpop.f32.mrf.mxu0 }
 0xfdf   : > { %v2377_v51 = vpop.f32.mrf.mxu0 }
 0xfe1   : > { %v3452_v52 = vpop.f32.mrf.mxu0 }
 0xfe7   : > { %v2420_v53 = vpop.f32.mrf.mxu1 }
 0xfe8   : > { %2550 = vxpose.xlu0.b32.start.end [1/1] (short) (narrow) %v2420_v53, 8 }
 0xfe9   : > { %v3457_v55 = vpop.f32.mrf.mxu1 }
 0xfeb   : > { %v2423_v56 = vpop.f32.mrf.mxu1 }
 0xfed   : > { %v3458_v57 = vpop.f32.mrf.mxu1 }
0x1035   : > { %v2466_v58 = vpop.f32.mrf.mxu0 }
0x1036   : > { %2582 = vxpose.xlu1.b32.start.end [1/1] (short) (narrow) %v2466_v58, 8 }
0x1037   : > { %v3463_v59 = vpop.f32.mrf.mxu0 }
0x1039   : > { %v2469_v60 = vpop.f32.mrf.mxu0 }
0x103b   : > { %v3464_v61 = vpop.f32.mrf.mxu0 }
0x103c   : > { %v2512_v62 = vpop.f32.mrf.mxu1 }
0x103d   : > { %2614 = vxpose.xlu0.b32.start.end [1/1] (short) (narrow) %v2512_v62, 8  ;;  %v2801_v62 = vrot.slane %v4379_v45, %v1532_v20  ;;  %v3634_v20 = vld [vmem:[#allocation10] sm:$0xff]  }
0x103e   : > { %v3469_v0 = vpop.f32.mrf.mxu1 }
0x1040   : > { %v2515_v4 = vpop.f32.mrf.mxu1 }
0x1042   : > { %v3470_v5 = vpop.f32.mrf.mxu1 }
0x1058   : > { %v2534_v8 = vpop.trf.xlu0 }
0x1064   : > { %v2566_v9 = vpop.trf.xlu0 }
0x10b2   : > { %v2598_v28 = vpop.trf.xlu1 }
0x10b3   : > { %v2646_v10 = vcombine.low %v2534_v8, %v2598_v28  ;;  %v2647_v11 = vcombine.high %v2534_v8, %v2598_v28 }
0x10b5   : > { %v2654_v15 = vrot.slane %v2646_v10, %v4272_v30  ;;  %v2661_v16 = vrot.slane %v2647_v11, %v4272_v30 }
0x10b9   : > { %v2630_v12 = vpop.trf.xlu0 }
0x10ba   : > { %v2662_v13 = vcombine.low %v2566_v9, %v2630_v12  ;;  %v2663_v14 = vcombine.high %v2566_v9, %v2630_v12 }
0x10bc   : > { %v2670_v18 = vrot.slane %v2662_v13, %v4272_v30  ;;  %v2677_v19 = vrot.slane %v2663_v14, %v4272_v30 }
0x10be   : > { %v2678_v7 = vcombine.low %v2654_v15, %v2670_v18  ;;  %v2679_v21 = vcombine.high %v2654_v15, %v2670_v18  ;;  %v2694_v22 = vcombine.low %v2661_v16, %v2677_v19  ;;  %v2695_v23 = vcombine.high %v2661_v16, %v2677_v19  ;;  %v3633_v16 = vld [vmem:[#allocation10 + $0x8] sm:$0xff]   ;;  %v3636_v18 = vld [vmem:[%s4569_s11 + $0x10] sm:$0xff]  }
0x10bf   : > { %3480 = vmatpush3.bf16.msra.mxu1 %v3633_v16 }
0x10c0   : > { %v2686_v25 = vrot.slane %v2678_v7, %v4275_v36  ;;  %v2693_v26 = vrot.slane %v2679_v21, %v4275_v36  ;;  %v2702_v27 = vrot.slane %v2694_v22, %v4275_v36  ;;  %v2709_v29 = vrot.slane %v2695_v23, %v4275_v36  ;;  %3481 = vmatprep.subr.bf16.mxu1 %v3923_v1 }
0x10c1   : > { %v2874_v22 = vrot.slane %v4379_v45, %v1606_v43  ;;  %v3638_v43 = vld [vmem:[%s4569_s11] sm:$0xff]  }
0x10c2   : > { %v2714_v31 = vcombine.low %v2686_v25, %v2693_v26  ;;  %v3242_v33 = vcombine.high %v2686_v25, %v2693_v26  ;;  %v2730_v34 = vcombine.low %v2702_v27, %v2709_v29  ;;  %v3243_v35 = vcombine.high %v2702_v27, %v2709_v29 }
0x10c3   : > { %3482 = vmatpush3.bf16.msra.mxu1 %v3634_v20  ;;  %v2879_v25 = vrot.slane %v4379_v45, %v1611_v44  ;;  %v2885_v44 = vrot.slane %v4379_v45, %v1617_v54 }
0x10c4   : > { %v2721_v38 = vrot.slane %v2714_v31, %v4272_v30  ;;  %v2729_v6 = vrot.slane %v3242_v33, %v4272_v30  ;;  %v2737_v39 = vrot.slane %v2730_v34, %v4272_v30  ;;  %v2745_v40 = vrot.slane %v3243_v35, %v4272_v30  ;;  %v3637_v31 = vld [vmem:[%s4569_s11 + $0x8] sm:$0xff]  }
0x10c6   : > { %v2747_v41 = vcombine.high %v2721_v38, %v2729_v6  ;;  %v2763_v42 = vcombine.high %v2737_v39, %v2745_v40  ;;  %v2746_v46 = vcombine.low %v2721_v38, %v2729_v6  ;;  %v2762_v47 = vcombine.low %v2737_v39, %v2745_v40 }
0x10c8   : > { %v2761_v48 = vrot.slane %v2747_v41, %v4275_v36  ;;  %v2777_v49 = vrot.slane %v2763_v42, %v4275_v36  ;;  %v2754_v50 = vrot.slane %v2746_v46, %v4275_v36  ;;  %v2770_v51 = vrot.slane %v2762_v47, %v4275_v36 }
0x10ca   : > { %v2780_v52 = vcombine.low %v2761_v48, %v2777_v49  ;;  %v2779_v53 = vcombine.high %v2754_v50, %v2770_v51  ;;  %v2778_v55 = vcombine.low %v2754_v50, %v2770_v51  ;;  %v2781_v30 = vcombine.high %v2761_v48, %v2777_v49 }
0x10cc   : > { %2787 = vrot.lane.b32.xlu1 %v2780_v52, %s3933_s22  ;;  %2783 = vrot.lane.b32.xlu0 %v2779_v53, %s3934_s30  ;;  %s3040_s22 = scalar_lea.sflag [#allocation4], %s532_s23  ;;  %s3835_s30 = scalar_lea.vmem %s3054_s19, 128 }
0x10cd   : > { %p3836_p7 = scmp.ne.s32.totalorder %s3054_s19, %s3835_s30 }
0x10cf   : > { %p3837_p8 = pnand %p3836_p7, %p4045_p5 }
0x10d0   : > { %2791 = vrot.lane.b32.xlu1 %v2781_v30, %s3935_s27  ;;  %s3936_s27 = smov [#allocation13]  }
0x10d1   : > { %p3838_p0 = pneg %p3837_p8  ;;  %s3839_s21 = sshll.u32 %s3936_s27, 4  ;;  %s3840_s21 = int_to_ptr.vmem [resolvable:$false] %s3839_s21 }
0x10d2   : > { %s3841_s29 = scalar_lea.vmem %s3840_s21, 256  ;;  %p3842_p13 = scmp.lt.s32.totalorder %s3054_s19, %s3840_s21 }
0x10d3   : > { %p3843_p11 = scmp.lt.s32.totalorder %s3841_s29, %s3835_s30 }
0x10d5   : > { %p3844_p1 = por %p3843_p11, %p3842_p13 }
0x10d7   : > { %p3845_p2 = pnand %p3844_p1, %p3838_p0 }
0x113e   : > { %v2788_v56 = vpop.permute.xlu1 %2787  ;;  %v2784_v57 = vpop.permute.xlu0 %2783 }
0x113f   : > { %v2794_v58 = vsel %vm750_vm3, %v2778_v55, %v2784_v57  ;;  %v1797_v55 = vld [vmem:[#allocation11 + $0x8] sm:$0x3] }
0x1140   : > { %v2795_v60 = vsel %vm1525_vm4, %v2794_v58, %v2788_v56  ;;  %v3031_v30 = vrot.slane %v1797_v55, %v4199_v17  ;;  %v3036_v58 = vrot.slane %v1797_v55, %v4169_v3 }
0x1142   : > { %v2792_v59 = vpop.permute.xlu1 %2791 }
0x1143   : > { %v2796_v61 = vsel %vm1527_vm5, %v2795_v60, %v2792_v59 }
0x1144   : > { %v2797_v36 = vpack.c.bf16 %v2796_v61, %v2796_v61 }
0x1146   : > { %3476 = vmatmul.mubr.msk.bf16.vlgmr.msra.gmra.mxu0 %vm583_vm1, %v2797_v36 }
0x1147   : > { %3495 = vmatprep.mubr.msk.bf16.mxu0 %vm3924_vm0, %v3923_v1 }
0x1206   : > { %v2851_v0 = vpop.f32.mrf.mxu0 }
0x1207   : > { %v2852_v4 = vadd.f32 %v2851_v0, %v2801_v62 }
0x1208   : > { %v3477_v5 = vpop.f32.mrf.mxu0 }
0x1209   : > { %v2857_v8 = vadd.f32 %v2852_v4, %v4364_v32  ;;  %v3635_v32 = vld [vmem:[%s4569_s11 + $0x18] sm:$0xff]  }
0x120a   : > { %v2854_v9 = vpop.f32.mrf.mxu0  ;;  %3488 = vmatpush3.bf16.msra.mxu0 %v3635_v32 }
0x120b   : > { %v2858_v28 = vsel %vm583_vm1, %v2857_v8, 0.0  ;;  %3489 = vmatprep.subr.bf16.mxu0 %v3923_v1 }
0x120c   : > { %2859 = vadd.xlane.f32.xlu1 %v2858_v28  ;;  %v3478_v10 = vpop.f32.mrf.mxu0 }
0x120e   : > { %3490 = vmatpush3.bf16.msra.mxu0 %v3636_v18 }
0x120f   : > { %3491 = vmatprep.subr.bf16.mxu0 %v3923_v1 }
0x1212   : > { %3492 = vmatpush3.bf16.msra.mxu0 %v3637_v31 }
0x1213   : > { %3493 = vmatprep.subr.bf16.mxu0 %v3923_v1  ;;  %v2946_v1 = vrot.slane %v4379_v45, %v1678_v63 }
0x1216   : > { %3494 = vmatpush3.bf16.msra.mxu0 %v3638_v43 }
0x1295   : > { %v2860_v11 = vpop.xlane.xlu1 %2859 }
0x1296   : > { %v2861_v12 = vmul.f32 0.03125, %v2860_v11 }
0x1298   : > { %v2862_v13 = vsub.f32 %v2857_v8, %v2861_v12 }
0x129a   : > { %v2863_v14 = vmul.f32 %v2862_v13, %v2862_v13 }
0x129c   : > { %v2864_v15 = vsel %vm583_vm1, %v2863_v14, 0.0 }
0x129d   : > { %2865 = vadd.xlane.f32.xlu0 %v2864_v15 }
0x1326   : > { %v2866_v19 = vpop.xlane.xlu0 %2865 }
0x1327   : > { %v2867_v7 = vmul.f32 0.03125, %v2866_v19 }
0x1329   : > { %v2868_v21 = vadd.f32 1e-05, %v2867_v7 }
0x132b   : > { %3675 = vrsqrt.f32 %v2868_v21 }
0x1338   : > { %v3676_v23 = vpop.eup %3675 }
0x1339   : > { %v2870_v24 = vmul.f32 %v3676_v23, %v2862_v13 }
0x133b   : > { %v2875_v26 = vmul.f32 %v2874_v22, %v2870_v24 }
0x133d   : > { %v2880_v27 = vadd.f32 %v2879_v25, %v2875_v26 }
0x133f   : > { %v2881_v29 = vpack.c.bf16 %v2880_v27, %v2880_v27 }
0x1341   : > { %3484 = vmatmul.mubr.msk.bf16.vlgmr.msra.gmra.mxu1 %vm583_vm1, %v2881_v29 }
0x1401   : > { %v2935_v33 = vpop.f32.mrf.mxu1 }
0x1402   : > { %v2936_v34 = vadd.f32 %v2935_v33, %v2885_v44 }
0x1403   : > { %v3485_v35 = vpop.f32.mrf.mxu1 }
0x1404   : > { %v2941_v37 = vmax.f32 %v2936_v34, 0.0 }
0x1405   : > { %v2938_v38 = vpop.f32.mrf.mxu1 }
0x1406   : > { %v2942_v6 = vpack.c.bf16 %v2941_v37, %v2941_v37 }
0x1407   : > { %v3486_v39 = vpop.f32.mrf.mxu1 }
0x1408   : > { %3496 = vmatmul.mubr.msk.bf16.vlgmr.msra.gmra.mxu0 %vm1704_vm6, %v2942_v6 }
0x14c8   : > { %v3008_v40 = vpop.f32.mrf.mxu0 }
0x14c9   : > { %v3009_v41 = vadd.f32 %v3008_v40, %v2946_v1 }
0x14ca   : > { %v3497_v42 = vpop.f32.mrf.mxu0 }
0x14cb   : > { %v3014_v46 = vadd.f32 %v3009_v41, %v2880_v27 }
0x14cc   : > { %v3011_v47 = vpop.f32.mrf.mxu0 }
0x14cd   : > { %v3015_v54 = vsel %vm583_vm1, %v3014_v46, 0.0 }
0x14ce   : > { %3016 = vadd.xlane.f32.xlu0 %v3015_v54  ;;  %v3498_v48 = vpop.f32.mrf.mxu0 }
0x1557   : > { %v3017_v49 = vpop.xlane.xlu0 %3016 }
0x1558   : > { %v3018_v50 = vmul.f32 0.03125, %v3017_v49 }
0x155a   : > { %v3019_v51 = vsub.f32 %v3014_v46, %v3018_v50 }
0x155c   : > { %v3020_v52 = vmul.f32 %v3019_v51, %v3019_v51 }
0x155e   : > { %v3021_v53 = vsel %vm583_vm1, %v3020_v52, 0.0 }
0x155f   : > { %3022 = vadd.xlane.f32.xlu1 %v3021_v53 }
0x15e8   : > { %v3023_v2 = vpop.xlane.xlu1 %3022 }
0x15e9   : > { %v3024_v63 = vmul.f32 0.03125, %v3023_v2 }
0x15eb   : > { %v3025_v45 = vadd.f32 1e-05, %v3024_v63 }
0x15ed   : > { %3677 = vrsqrt.f32 %v3025_v45 }
0x15fa   : > { %v3678_v56 = vpop.eup %3677 }
0x15fb   : > { %v3027_v57 = vmul.f32 %v3678_v56, %v3019_v51 }
0x15fd   : > { %v3032_v59 = vmul.f32 %v3031_v30, %v3027_v57 }
0x15ff   : > { %v3037_v60 = vadd.f32 %v3036_v58, %v3032_v59 }
0x1601   : > { %3038 = vst.msk [vmem:[%s534_s14] sm:$0xff] %vm583_vm1, %v3037_v60 }
0x1602   : > { %3848 = shalt.err (!%p3845_p2)
}
0x1603   : > { %s3849_s16 = scalar_lea.hbm %s3051_s28, 128  ;;  %s3853_s15 = scalar_lea.hbm %s4571_s13, 256 }
0x1604   : > { %p3850_p3 = scmp.ne.s32.totalorder %s3051_s28, %s3849_s16  ;;  %p3854_p9 = scmp.lt.s32.totalorder %s3051_s28, %s4571_s13 }
0x1605   : > { %p3855_p4 = scmp.lt.s32.totalorder %s3853_s15, %s3849_s16 }
0x1606   : > { %p3851_p12 = pnand %p3850_p3, %p4045_p5 }
0x1607   : > { %p3856_p7 = por %p3855_p4, %p3854_p9 }
0x1608   : > { %p3852_p10 = pneg %p3851_p12 }
0x160a   : > { %p3857_p8 = pnand %p3856_p7, %p3852_p10 }
0x160c   : > { %3860 = shalt.err (!%p3857_p8)
}
0x160d   : > { %3523 = dma.vmem_to_hbm [thread:$0]  (%p4045_p5), %s3054_s19, 128, %s3051_s28, %s3040_s22  }
0x160e PF: > { %s4602_s17 = sld [smem:[#allocation21_spill]] }
0x160f   : > { %s4603_s25 = sld [smem:[#allocation19_spill]] }
0x1614   : > { %p3560_p0 = scmp.ge.s32.totalorder %s4602_s17, 2 }
0x1615   : > { %s3065_s27 = sand.u32 1, %s4603_s25  }
0x1616   : > { %p3545_p13 = pnand %p3560_p0, %p4049_p6  ;;  %s3066_s21 = scalar_lea.sflag [#allocation4], %s3065_s27 }
0x1618   : > { %p3546_p11 = pneg %p3545_p13 }
0x161a   : > { %3894 = dma.done.wait (%p3546_p11), %s3066_s21, 128  }
0x161b   : > { %3896 = vsyncadd (%p3546_p11), %s3066_s21, 4294967168  ;;  %s4605_s28 = sld [smem:[#allocation22_spill]]  ;;  %s4608_s25 = smov %s3903_s26 }
0x161c   : > { %s4606_s29 = sld [smem:[#allocation20_spill]] }
0x161d   : > { %s4607_s27 = sld [smem:[#allocation23_spill]] }
0x1621   : > { %p27_p1 = scmp.ge.s32.totalorder %s4605_s28, 4  }
0x1622   : > { %s4609_s26 = smov %s4606_s29 }
0x1623   :  { %29 = sbr.rel (!%p27_p1) target bundleno = 7 (0x7), region = 135 }
0x1628   :  { %3071 = vsyncpa [#allocation3], 1 }
0x1629   :  { %3073 = vsyncpa [#allocation3 + $0x1], 1 }
0x162a   :  { %3074 = vsyncpa [#allocation6], 1 }
0x162b   :  { %3075 = vsyncpa [#allocation9], 1 }
0x162c   :  { %3076 = vsyncpa [#allocation12], 1 }
0x162d   :  { %3077 = vsyncpa [#allocation4], 1 }
0x162e   :  { %3079 = vsyncpa [#allocation4 + $0x1], 1 }

</bundles_post_ra>
